<compile_context>
chip_gen: v7x
topology: tpu7x:2x2x1
jax: 0.10.0
libtpu: 0.0.40
codegen_flags: <defaults>
</compile_context>

<pallas_src>
import functools

import jax
import jax.numpy as jnp
import numpy as np
from jax.experimental import pallas as pl
from jax.experimental.pallas import tpu as pltpu

EPS = 1e-5


# ------------------------------ fused kernel ------------------------------- #

def _basic_block_kernel(*refs, stride, has_down):
    if has_down:
        (x_ref, w1_ref, b1_ref, w2_ref, b2_ref, wd_ref, bd_ref,
         o_ref, xp_ref, yp_ref) = refs
    else:
        (x_ref, w1_ref, b1_ref, w2_ref, b2_ref,
         o_ref, xp_ref, yp_ref) = refs
        wd_ref = bd_ref = None

    H, W, Cin = x_ref.shape[1], x_ref.shape[2], x_ref.shape[3]
    P = o_ref.shape[3]
    s = stride
    Ho, Wo = H // s, W // s

    # ---- zero-padded input lives in VMEM scratch (no HBM pad copy) ----
    # Full zero-fill every grid step is only a few KiB of vstores and keeps the
    # border correct even when the batch grid axis is sharded across TCs.
    xp_ref[...] = jnp.zeros(xp_ref.shape, xp_ref.dtype)
    xp_ref[1:H + 1, 1:W + 1, :] = x_ref[0]

    # ---- column phases of the padded input ----
    # phase pc holds padded columns pc, pc+s, pc+2s, ... (strided sublane read).
    if s == 1:
        phases = [xp_ref[...]]
        pcols = [W + 2]
    else:
        phases, pcols = [], []
        for pc in range(s):
            cnt = (W + 2 - pc + s - 1) // s
            phases.append(xp_ref[:, pl.ds(pc, cnt, stride=s), :])
            pcols.append(cnt)

    def conv1_tap(ky, kx):
        # Rows are decimated by s with a leading-dim-only reshape (layout-safe);
        # columns were decimated once per phase above.
        pc, c0 = kx % s, kx // s
        ph, cnt = phases[pc], pcols[pc]
        if s == 1:
            rows = ph[ky:ky + Ho]                                     # (Ho, cnt, Cin)
        else:
            rows = ph[ky:ky + Ho * s].reshape(Ho, s, cnt, Cin)[:, 0]  # (Ho, cnt, Cin)
        return rows[:, c0:c0 + Wo, :].reshape(Ho * Wo, Cin)

    taps = [conv1_tap(ky, kx) for ky in range(3) for kx in range(3)]
    center = taps[4]   # == x sampled at the strided output grid (f32)

    # ---- conv1 + folded-BN1 + ReLU : single im2col matmul, K = 9*Cin ----
    im1 = jnp.concatenate([t.astype(jnp.bfloat16) for t in taps], axis=-1)
    y1 = jnp.dot(im1, w1_ref[...], preferred_element_type=jnp.float32)
    y1 = jnp.maximum(y1 + b1_ref[...], 0.0)                           # (Ho*Wo, P) f32

    # ---- residual branch (fused; 1x1 stride-s conv input == center tap) ----
    if has_down:
        r = jnp.dot(center.astype(jnp.bfloat16), wd_ref[...],
                    preferred_element_type=jnp.float32)
        r = r + bd_ref[...]
    else:
        r = center                                                    # Cin == P here

    # ---- conv2 + folded-BN2 + ReLU on zero-padded y1 (bf16 VMEM scratch) ----
    yp_ref[...] = jnp.zeros(yp_ref.shape, yp_ref.dtype)
    yp_ref[1:Ho + 1, 1:Wo + 1, :] = y1.reshape(Ho, Wo, P).astype(yp_ref.dtype)
    taps2 = [yp_ref[ky:ky + Ho, kx:kx + Wo, :].reshape(Ho * Wo, P)
             for ky in range(3) for kx in range(3)]
    im2 = jnp.concatenate(taps2, axis=-1)                             # (Ho*Wo, 9*P) bf16
    y2 = jnp.dot(im2, w2_ref[...], preferred_element_type=jnp.float32)
    y2 = jnp.maximum(y2 + b2_ref[...], 0.0)

    # SEA-RAFT ordering: relu(residual + relu(bn2(conv2(y)))).
    out = jnp.maximum(r + y2, 0.0)
    o_ref[0] = out.reshape(Ho, Wo, P).astype(o_ref.dtype)


# ------------------------------ Pallas wrapper ------------------------------ #

def basic_block_fused(x_nhwc, params, stride):
    N, H, W, Cin = x_nhwc.shape
    P = params['w1'].shape[-1]
    assert H % stride == 0 and W % stride == 0, "stride must divide H and W"
    Ho, Wo = H // stride, W // stride
    has_down = 'wd' in params

    s1, b1 = _fold_bn(params['b1'], params['bn1'])
    s2, b2 = _fold_bn(params['b2'], params['bn2'])
    # Fold BN scale into weights (per output channel), reshape HWIO (3,3,Cin,P)
    # -> im2col layout (9*Cin, P); bf16 MXU operands, f32 accumulation.
    w1 = (params['w1'] * s1).reshape(9 * Cin, P).astype(jnp.bfloat16)
    w2 = (params['w2'] * s2).reshape(9 * P, P).astype(jnp.bfloat16)

    args = [x_nhwc, w1, b1.reshape(1, P), w2, b2.reshape(1, P)]
    in_specs = [
        pl.BlockSpec((1, H, W, Cin), lambda n: (n, 0, 0, 0)),
        pl.BlockSpec((9 * Cin, P), lambda n: (0, 0)),
        pl.BlockSpec((1, P), lambda n: (0, 0)),
        pl.BlockSpec((9 * P, P), lambda n: (0, 0)),
        pl.BlockSpec((1, P), lambda n: (0, 0)),
    ]
    if has_down:
        sd, bd = _fold_bn(params['bd'], params['bn3'])
        wd = (params['wd'] * sd).astype(jnp.bfloat16)
        args += [wd, bd.reshape(1, P)]
        in_specs += [
            pl.BlockSpec((Cin, P), lambda n: (0, 0)),
            pl.BlockSpec((1, P), lambda n: (0, 0)),
        ]

    kernel = functools.partial(_basic_block_kernel, stride=stride, has_down=has_down)
    return pl.pallas_call(
        kernel,
        out_shape=jax.ShapeDtypeStruct((N, Ho, Wo, P), x_nhwc.dtype),
        grid=(N,),
        in_specs=in_specs,
        out_specs=pl.BlockSpec((1, Ho, Wo, P), lambda n: (n, 0, 0, 0)),
        scratch_shapes=[
            pltpu.VMEM((H + 2, W + 2, Cin), jnp.float32),     # padded input (f32 keeps identity residual exact)
            pltpu.VMEM((Ho + 2, Wo + 2, P), jnp.bfloat16),    # padded conv1 output (MXU operand dtype)
        ],
        compiler_params=pltpu.CompilerParams(dimension_semantics=("parallel",)),
    )(*args)


def basic_block_forward(x_nchw, params, stride):
    x = jnp.transpose(x_nchw, (0, 2, 3, 1))   # NCHW -> NHWC (boundary only)
    out = basic_block_fused(x, params, stride)
    return jnp.transpose(out, (0, 3, 1, 2))   # NHWC -> NCHW


# ------------------------------ parameter glue ------------------------------ #

def _make_bn_params(key, planes):
    k1, k2, k3, k4 = jax.random.split(key, 4)
    gamma = 1.0 + 0.1 * jax.random.normal(k1, (planes,), jnp.float32)
    beta = 0.1 * jax.random.normal(k2, (planes,), jnp.float32)
    mean = 0.1 * jax.random.normal(k3, (planes,), jnp.float32)
    var = jax.random.uniform(k4, (planes,), jnp.float32, minval=0.5, maxval=1.5)
    return gamma, beta, mean, var


def init_basic_block_params(key, in_planes, planes, stride):
    ks = jax.random.split(key, 9)
    params = dict(
        w1=0.2 * jax.random.normal(ks[0], (3, 3, in_planes, planes), jnp.float32),
        b1=0.05 * jax.random.normal(ks[1], (planes,), jnp.float32),
        w2=0.2 * jax.random.normal(ks[2], (3, 3, planes, planes), jnp.float32),
        b2=0.05 * jax.random.normal(ks[3], (planes,), jnp.float32),
        bn1=_make_bn_params(ks[4], planes),
        bn2=_make_bn_params(ks[5], planes),
    )
    if stride != 1 or in_planes != planes:
        params['wd'] = 0.2 * jax.random.normal(ks[6], (in_planes, planes), jnp.float32)
        params['bd'] = 0.05 * jax.random.normal(ks[7], (planes,), jnp.float32)
        params['bn3'] = _make_bn_params(ks[8], planes)
    return params


def _fold_bn(conv_bias, bn_params):
    gamma, beta, mean, var = bn_params
    scale = gamma / jnp.sqrt(var + EPS)
    bias = (conv_bias - mean) * scale + beta
    return scale, bias


# ---------------------------- pure-JAX reference ---------------------------- #

def ref_basic_block(x_nchw, params, stride):
    x = jnp.transpose(x_nchw, (0, 2, 3, 1))

    def conv3(z, w, b, s):
        y = jax.lax.conv_general_dilated(
            z, w, (s, s), ((1, 1), (1, 1)),
            dimension_numbers=('NHWC', 'HWIO', 'NHWC'))
        return y + b

    def bn(z, p):
        gamma, beta, mean, var = p
        return (z - mean) / jnp.sqrt(var + EPS) * gamma + beta

    y = jax.nn.relu(bn(conv3(x, params['w1'], params['b1'], stride), params['bn1']))
    y = jax.nn.relu(bn(conv3(y, params['w2'], params['b2'], 1), params['bn2']))
    if 'wd' in params:
        wd = params['wd'].reshape(1, 1, *params['wd'].shape)
        xd = jax.lax.conv_general_dilated(
            x, wd, (stride, stride), ((0, 0), (0, 0)),
            dimension_numbers=('NHWC', 'HWIO', 'NHWC')) + params['bd']
        x = bn(xd, params['bn3'])
    out = jax.nn.relu(x + y)
    return jnp.transpose(out, (0, 3, 1, 2))


# ----------------------------------- main ----------------------------------- #

if __name__ == "__main__":
    key = jax.random.PRNGKey(0)
    kx, kp1, kp2 = jax.random.split(key, 3)

    N, Cin, H, W = 2, 4, 16, 16
    x = jax.random.normal(kx, (N, Cin, H, W), jnp.float32)

    # Tolerance accounts for bf16 MXU operands (f32 accumulation/epilogue).
    TOL = 2e-2

    # Case 1: stride=2, channel change -> exercises the fused downsample branch
    # and the in-kernel strided conv1.
    planes, stride = 8, 2
    p1 = init_basic_block_params(kp1, Cin, planes, stride)
    out1 = jax.block_until_ready(basic_block_forward(x, p1, stride))
    ref1 = ref_basic_block(x, p1, stride)
    assert out1.shape == (N, planes, H // stride, W // stride)
    np.testing.assert_allclose(np.asarray(out1), np.asarray(ref1), rtol=TOL, atol=TOL)

    # Case 2: stride=1, same planes -> identity residual path (no downsample).
    p2 = init_basic_block_params(kp2, Cin, Cin, 1)
    out2 = jax.block_until_ready(basic_block_forward(x, p2, 1))
    ref2 = ref_basic_block(x, p2, 1)
    assert out2.shape == (N, Cin, H, W)
    np.testing.assert_allclose(np.asarray(out2), np.asarray(ref2), rtol=TOL, atol=TOL)

    print("KERNEL_OK")
</pallas_src>

<mosaic_0001>
module attributes {stable_mosaic.version = 11 : i64} {
  func.func @_basic_block_kernel(%arg0: i32, %arg1: memref<1x16x16x4xf32, #tpu.memory_space<vmem>>, %arg2: memref<36x8xbf16, #tpu.memory_space<vmem>>, %arg3: memref<1x8xf32, #tpu.memory_space<vmem>>, %arg4: memref<72x8xbf16, #tpu.memory_space<vmem>>, %arg5: memref<1x8xf32, #tpu.memory_space<vmem>>, %arg6: memref<4x8xbf16, #tpu.memory_space<vmem>>, %arg7: memref<1x8xf32, #tpu.memory_space<vmem>>, %arg8: memref<1x8x8x8xf32, #tpu.memory_space<vmem>>, %arg9: memref<18x18x4xf32, #tpu.memory_space<vmem>>, %arg10: memref<10x10x8xbf16, #tpu.memory_space<vmem>>) attributes {dimension_semantics = [#tpu.dimension_semantics<parallel>], iteration_bounds = array<i64: 2>, scalar_prefetch = 0 : i64, scratch_operands = 2 : i64, tpu.core_type = #tpu.core_type<tc>, window_params = [{transform_indices = @transform_0, window_bounds = array<i64: 1, 16, 16, 4>}, {pipeline_mode = #tpu.pipeline_mode<synchronous>, transform_indices = @transform_1, window_bounds = array<i64: 36, 8>}, {pipeline_mode = #tpu.pipeline_mode<synchronous>, transform_indices = @transform_2, window_bounds = array<i64: 1, 8>}, {pipeline_mode = #tpu.pipeline_mode<synchronous>, transform_indices = @transform_3, window_bounds = array<i64: 72, 8>}, {pipeline_mode = #tpu.pipeline_mode<synchronous>, transform_indices = @transform_4, window_bounds = array<i64: 1, 8>}, {pipeline_mode = #tpu.pipeline_mode<synchronous>, transform_indices = @transform_5, window_bounds = array<i64: 4, 8>}, {pipeline_mode = #tpu.pipeline_mode<synchronous>, transform_indices = @transform_6, window_bounds = array<i64: 1, 8>}, {transform_indices = @transform_7, window_bounds = array<i64: 1, 8, 8, 8>}]} {
    %cst = arith.constant 0.000000e+00 : f32
    %0 = vector.broadcast %cst : f32 to vector<18x18x4xf32>
    %c0 = arith.constant 0 : index
    %c0_0 = arith.constant 0 : index
    %c0_1 = arith.constant 0 : index
    %1 = vector.load %arg9[%c0, %c0_0, %c0_1] : memref<18x18x4xf32, #tpu.memory_space<vmem>>, vector<18x18x4xf32>
    tpu.vector_store %arg9[%c0, %c0_0, %c0_1], %0 {strides = array<i32>} : memref<18x18x4xf32, #tpu.memory_space<vmem>>, vector<18x18x4xf32>,
    %c0_2 = arith.constant 0 : index
    %c0_3 = arith.constant 0 : index
    %c0_4 = arith.constant 0 : index
    %c0_5 = arith.constant 0 : index
    %2 = vector.load %arg1[%c0_2, %c0_3, %c0_4, %c0_5] : memref<1x16x16x4xf32, #tpu.memory_space<vmem>>, vector<1x16x16x4xf32>
    %3 = vector.shape_cast %2 : vector<1x16x16x4xf32> to vector<16x16x4xf32>
    %c1 = arith.constant 1 : index
    %c1_6 = arith.constant 1 : index
    %c0_7 = arith.constant 0 : index
    %4 = vector.load %arg9[%c1, %c1_6, %c0_7] : memref<18x18x4xf32, #tpu.memory_space<vmem>>, vector<16x16x4xf32>
    tpu.vector_store %arg9[%c1, %c1_6, %c0_7], %3 {strides = array<i32>} : memref<18x18x4xf32, #tpu.memory_space<vmem>>, vector<16x16x4xf32>,
    %c0_8 = arith.constant 0 : index
    %c0_9 = arith.constant 0 : index
    %c0_10 = arith.constant 0 : index
    %5 = tpu.strided_load %arg9[%c0_8, %c0_9, %c0_10] {strides = array<i32: 1, 2, 1>} : memref<18x18x4xf32, #tpu.memory_space<vmem>>, vector<18x9x4xf32>
    %c0_11 = arith.constant 0 : index
    %c1_12 = arith.constant 1 : index
    %c0_13 = arith.constant 0 : index
    %6 = tpu.strided_load %arg9[%c0_11, %c1_12, %c0_13] {strides = array<i32: 1, 2, 1>} : memref<18x18x4xf32, #tpu.memory_space<vmem>>, vector<18x9x4xf32>
    %7 = vector.extract_strided_slice %5 {offsets = [0, 0, 0], sizes = [16, 9, 4], strides = [1, 1, 1]} : vector<18x9x4xf32> to vector<16x9x4xf32>
    %8 = vector.shape_cast %7 : vector<16x9x4xf32> to vector<8x2x9x4xf32>
    %9 = vector.extract_strided_slice %8 {offsets = [0, 0, 0, 0], sizes = [8, 1, 9, 4], strides = [1, 1, 1, 1]} : vector<8x2x9x4xf32> to vector<8x1x9x4xf32>
    %10 = vector.shape_cast %9 : vector<8x1x9x4xf32> to vector<8x9x4xf32>
    %11 = vector.extract_strided_slice %10 {offsets = [0, 0, 0], sizes = [8, 8, 4], strides = [1, 1, 1]} : vector<8x9x4xf32> to vector<8x8x4xf32>
    %12 = vector.shape_cast %11 : vector<8x8x4xf32> to vector<64x4xf32>
    %13 = vector.extract_strided_slice %6 {offsets = [0, 0, 0], sizes = [16, 9, 4], strides = [1, 1, 1]} : vector<18x9x4xf32> to vector<16x9x4xf32>
    %14 = vector.shape_cast %13 : vector<16x9x4xf32> to vector<8x2x9x4xf32>
    %15 = vector.extract_strided_slice %14 {offsets = [0, 0, 0, 0], sizes = [8, 1, 9, 4], strides = [1, 1, 1, 1]} : vector<8x2x9x4xf32> to vector<8x1x9x4xf32>
    %16 = vector.shape_cast %15 : vector<8x1x9x4xf32> to vector<8x9x4xf32>
    %17 = vector.extract_strided_slice %16 {offsets = [0, 0, 0], sizes = [8, 8, 4], strides = [1, 1, 1]} : vector<8x9x4xf32> to vector<8x8x4xf32>
    %18 = vector.shape_cast %17 : vector<8x8x4xf32> to vector<64x4xf32>
    %19 = vector.extract_strided_slice %5 {offsets = [0, 0, 0], sizes = [16, 9, 4], strides = [1, 1, 1]} : vector<18x9x4xf32> to vector<16x9x4xf32>
    %20 = vector.shape_cast %19 : vector<16x9x4xf32> to vector<8x2x9x4xf32>
    %21 = vector.extract_strided_slice %20 {offsets = [0, 0, 0, 0], sizes = [8, 1, 9, 4], strides = [1, 1, 1, 1]} : vector<8x2x9x4xf32> to vector<8x1x9x4xf32>
    %22 = vector.shape_cast %21 : vector<8x1x9x4xf32> to vector<8x9x4xf32>
    %23 = vector.extract_strided_slice %22 {offsets = [0, 1, 0], sizes = [8, 8, 4], strides = [1, 1, 1]} : vector<8x9x4xf32> to vector<8x8x4xf32>
    %24 = vector.shape_cast %23 : vector<8x8x4xf32> to vector<64x4xf32>
    %25 = vector.extract_strided_slice %5 {offsets = [1, 0, 0], sizes = [16, 9, 4], strides = [1, 1, 1]} : vector<18x9x4xf32> to vector<16x9x4xf32>
    %26 = vector.shape_cast %25 : vector<16x9x4xf32> to vector<8x2x9x4xf32>
    %27 = vector.extract_strided_slice %26 {offsets = [0, 0, 0, 0], sizes = [8, 1, 9, 4], strides = [1, 1, 1, 1]} : vector<8x2x9x4xf32> to vector<8x1x9x4xf32>
    %28 = vector.shape_cast %27 : vector<8x1x9x4xf32> to vector<8x9x4xf32>
    %29 = vector.extract_strided_slice %28 {offsets = [0, 0, 0], sizes = [8, 8, 4], strides = [1, 1, 1]} : vector<8x9x4xf32> to vector<8x8x4xf32>
    %30 = vector.shape_cast %29 : vector<8x8x4xf32> to vector<64x4xf32>
    %31 = vector.extract_strided_slice %6 {offsets = [1, 0, 0], sizes = [16, 9, 4], strides = [1, 1, 1]} : vector<18x9x4xf32> to vector<16x9x4xf32>
    %32 = vector.shape_cast %31 : vector<16x9x4xf32> to vector<8x2x9x4xf32>
    %33 = vector.extract_strided_slice %32 {offsets = [0, 0, 0, 0], sizes = [8, 1, 9, 4], strides = [1, 1, 1, 1]} : vector<8x2x9x4xf32> to vector<8x1x9x4xf32>
    %34 = vector.shape_cast %33 : vector<8x1x9x4xf32> to vector<8x9x4xf32>
    %35 = vector.extract_strided_slice %34 {offsets = [0, 0, 0], sizes = [8, 8, 4], strides = [1, 1, 1]} : vector<8x9x4xf32> to vector<8x8x4xf32>
    %36 = vector.shape_cast %35 : vector<8x8x4xf32> to vector<64x4xf32>
    %37 = vector.extract_strided_slice %5 {offsets = [1, 0, 0], sizes = [16, 9, 4], strides = [1, 1, 1]} : vector<18x9x4xf32> to vector<16x9x4xf32>
    %38 = vector.shape_cast %37 : vector<16x9x4xf32> to vector<8x2x9x4xf32>
    %39 = vector.extract_strided_slice %38 {offsets = [0, 0, 0, 0], sizes = [8, 1, 9, 4], strides = [1, 1, 1, 1]} : vector<8x2x9x4xf32> to vector<8x1x9x4xf32>
    %40 = vector.shape_cast %39 : vector<8x1x9x4xf32> to vector<8x9x4xf32>
    %41 = vector.extract_strided_slice %40 {offsets = [0, 1, 0], sizes = [8, 8, 4], strides = [1, 1, 1]} : vector<8x9x4xf32> to vector<8x8x4xf32>
    %42 = vector.shape_cast %41 : vector<8x8x4xf32> to vector<64x4xf32>
    %43 = vector.extract_strided_slice %5 {offsets = [2, 0, 0], sizes = [16, 9, 4], strides = [1, 1, 1]} : vector<18x9x4xf32> to vector<16x9x4xf32>
    %44 = vector.shape_cast %43 : vector<16x9x4xf32> to vector<8x2x9x4xf32>
    %45 = vector.extract_strided_slice %44 {offsets = [0, 0, 0, 0], sizes = [8, 1, 9, 4], strides = [1, 1, 1, 1]} : vector<8x2x9x4xf32> to vector<8x1x9x4xf32>
    %46 = vector.shape_cast %45 : vector<8x1x9x4xf32> to vector<8x9x4xf32>
    %47 = vector.extract_strided_slice %46 {offsets = [0, 0, 0], sizes = [8, 8, 4], strides = [1, 1, 1]} : vector<8x9x4xf32> to vector<8x8x4xf32>
    %48 = vector.shape_cast %47 : vector<8x8x4xf32> to vector<64x4xf32>
    %49 = vector.extract_strided_slice %6 {offsets = [2, 0, 0], sizes = [16, 9, 4], strides = [1, 1, 1]} : vector<18x9x4xf32> to vector<16x9x4xf32>
    %50 = vector.shape_cast %49 : vector<16x9x4xf32> to vector<8x2x9x4xf32>
    %51 = vector.extract_strided_slice %50 {offsets = [0, 0, 0, 0], sizes = [8, 1, 9, 4], strides = [1, 1, 1, 1]} : vector<8x2x9x4xf32> to vector<8x1x9x4xf32>
    %52 = vector.shape_cast %51 : vector<8x1x9x4xf32> to vector<8x9x4xf32>
    %53 = vector.extract_strided_slice %52 {offsets = [0, 0, 0], sizes = [8, 8, 4], strides = [1, 1, 1]} : vector<8x9x4xf32> to vector<8x8x4xf32>
    %54 = vector.shape_cast %53 : vector<8x8x4xf32> to vector<64x4xf32>
    %55 = vector.extract_strided_slice %5 {offsets = [2, 0, 0], sizes = [16, 9, 4], strides = [1, 1, 1]} : vector<18x9x4xf32> to vector<16x9x4xf32>
    %56 = vector.shape_cast %55 : vector<16x9x4xf32> to vector<8x2x9x4xf32>
    %57 = vector.extract_strided_slice %56 {offsets = [0, 0, 0, 0], sizes = [8, 1, 9, 4], strides = [1, 1, 1, 1]} : vector<8x2x9x4xf32> to vector<8x1x9x4xf32>
    %58 = vector.shape_cast %57 : vector<8x1x9x4xf32> to vector<8x9x4xf32>
    %59 = vector.extract_strided_slice %58 {offsets = [0, 1, 0], sizes = [8, 8, 4], strides = [1, 1, 1]} : vector<8x9x4xf32> to vector<8x8x4xf32>
    %60 = vector.shape_cast %59 : vector<8x8x4xf32> to vector<64x4xf32>
    %61 = arith.truncf %12 : vector<64x4xf32> to vector<64x4xbf16>
    %62 = arith.truncf %18 : vector<64x4xf32> to vector<64x4xbf16>
    %63 = arith.truncf %24 : vector<64x4xf32> to vector<64x4xbf16>
    %64 = arith.truncf %30 : vector<64x4xf32> to vector<64x4xbf16>
    %65 = arith.truncf %36 : vector<64x4xf32> to vector<64x4xbf16>
    %66 = arith.truncf %42 : vector<64x4xf32> to vector<64x4xbf16>
    %67 = arith.truncf %48 : vector<64x4xf32> to vector<64x4xbf16>
    %68 = arith.truncf %54 : vector<64x4xf32> to vector<64x4xbf16>
    %69 = arith.truncf %60 : vector<64x4xf32> to vector<64x4xbf16>
    %70 = tpu.concatenate %61, %62, %63, %64, %65, %66, %67, %68, %69 in 1 : vector<64x4xbf16>, vector<64x4xbf16>, vector<64x4xbf16>, vector<64x4xbf16>, vector<64x4xbf16>, vector<64x4xbf16>, vector<64x4xbf16>, vector<64x4xbf16>, vector<64x4xbf16> -> vector<64x36xbf16>
    %c0_14 = arith.constant 0 : index
    %c0_15 = arith.constant 0 : index
    %71 = vector.load %arg2[%c0_14, %c0_15] : memref<36x8xbf16, #tpu.memory_space<vmem>>, vector<36x8xbf16>
    %cst_16 = arith.constant dense<0.000000e+00> : vector<64x8xf32>
    %72 = tpu.matmul %70, %71, %cst_16 {dimension_numbers = #tpu.dot_dimension_numbers<[1], [0], [0], [1], [0, 0, 1, 1], [], []>} : vector<64x36xbf16>, vector<36x8xbf16>, vector<64x8xf32> -> vector<64x8xf32>
    %c0_17 = arith.constant 0 : index
    %c0_18 = arith.constant 0 : index
    %73 = vector.load %arg3[%c0_17, %c0_18] : memref<1x8xf32, #tpu.memory_space<vmem>>, vector<1x8xf32>
    %74 = vector.broadcast %73 : vector<1x8xf32> to vector<64x8xf32>
    %75 = arith.addf %72, %74 : vector<64x8xf32>
    %cst_19 = arith.constant 0.000000e+00 : f32
    %76 = vector.broadcast %cst_19 : f32 to vector<64x8xf32>
    %77 = arith.maximumf %75, %76 : vector<64x8xf32>
    %78 = arith.truncf %36 : vector<64x4xf32> to vector<64x4xbf16>
    %c0_20 = arith.constant 0 : index
    %c0_21 = arith.constant 0 : index
    %79 = vector.load %arg6[%c0_20, %c0_21] : memref<4x8xbf16, #tpu.memory_space<vmem>>, vector<4x8xbf16>
    %cst_22 = arith.constant dense<0.000000e+00> : vector<64x8xf32>
    %80 = tpu.matmul %78, %79, %cst_22 {dimension_numbers = #tpu.dot_dimension_numbers<[1], [0], [0], [1], [0, 0, 1, 1], [], []>} : vector<64x4xbf16>, vector<4x8xbf16>, vector<64x8xf32> -> vector<64x8xf32>
    %c0_23 = arith.constant 0 : index
    %c0_24 = arith.constant 0 : index
    %81 = vector.load %arg7[%c0_23, %c0_24] : memref<1x8xf32, #tpu.memory_space<vmem>>, vector<1x8xf32>
    %82 = vector.broadcast %81 : vector<1x8xf32> to vector<64x8xf32>
    %83 = arith.addf %80, %82 : vector<64x8xf32>
    %cst_25 = arith.constant 0.000000e+00 : bf16
    %84 = vector.broadcast %cst_25 : bf16 to vector<10x10x8xbf16>
    %c0_26 = arith.constant 0 : index
    %c0_27 = arith.constant 0 : index
    %c0_28 = arith.constant 0 : index
    %85 = vector.load %arg10[%c0_26, %c0_27, %c0_28] : memref<10x10x8xbf16, #tpu.memory_space<vmem>>, vector<10x10x8xbf16>
    tpu.vector_store %arg10[%c0_26, %c0_27, %c0_28], %84 {strides = array<i32>} : memref<10x10x8xbf16, #tpu.memory_space<vmem>>, vector<10x10x8xbf16>,
    %86 = vector.shape_cast %77 : vector<64x8xf32> to vector<8x8x8xf32>
    %87 = arith.truncf %86 : vector<8x8x8xf32> to vector<8x8x8xbf16>
    %c1_29 = arith.constant 1 : index
    %c1_30 = arith.constant 1 : index
    %c0_31 = arith.constant 0 : index
    %88 = vector.load %arg10[%c1_29, %c1_30, %c0_31] : memref<10x10x8xbf16, #tpu.memory_space<vmem>>, vector<8x8x8xbf16>
    tpu.vector_store %arg10[%c1_29, %c1_30, %c0_31], %87 {strides = array<i32>} : memref<10x10x8xbf16, #tpu.memory_space<vmem>>, vector<8x8x8xbf16>,
    %c0_32 = arith.constant 0 : index
    %c0_33 = arith.constant 0 : index
    %c0_34 = arith.constant 0 : index
    %89 = vector.load %arg10[%c0_32, %c0_33, %c0_34] : memref<10x10x8xbf16, #tpu.memory_space<vmem>>, vector<8x8x8xbf16>
    %90 = vector.shape_cast %89 : vector<8x8x8xbf16> to vector<64x8xbf16>
    %c0_35 = arith.constant 0 : index
    %c1_36 = arith.constant 1 : index
    %c0_37 = arith.constant 0 : index
    %91 = vector.load %arg10[%c0_35, %c1_36, %c0_37] : memref<10x10x8xbf16, #tpu.memory_space<vmem>>, vector<8x8x8xbf16>
    %92 = vector.shape_cast %91 : vector<8x8x8xbf16> to vector<64x8xbf16>
    %c0_38 = arith.constant 0 : index
    %c2 = arith.constant 2 : index
    %c0_39 = arith.constant 0 : index
    %93 = vector.load %arg10[%c0_38, %c2, %c0_39] : memref<10x10x8xbf16, #tpu.memory_space<vmem>>, vector<8x8x8xbf16>
    %94 = vector.shape_cast %93 : vector<8x8x8xbf16> to vector<64x8xbf16>
    %c1_40 = arith.constant 1 : index
    %c0_41 = arith.constant 0 : index
    %c0_42 = arith.constant 0 : index
    %95 = vector.load %arg10[%c1_40, %c0_41, %c0_42] : memref<10x10x8xbf16, #tpu.memory_space<vmem>>, vector<8x8x8xbf16>
    %96 = vector.shape_cast %95 : vector<8x8x8xbf16> to vector<64x8xbf16>
    %c1_43 = arith.constant 1 : index
    %c1_44 = arith.constant 1 : index
    %c0_45 = arith.constant 0 : index
    %97 = vector.load %arg10[%c1_43, %c1_44, %c0_45] : memref<10x10x8xbf16, #tpu.memory_space<vmem>>, vector<8x8x8xbf16>
    %98 = vector.shape_cast %97 : vector<8x8x8xbf16> to vector<64x8xbf16>
    %c1_46 = arith.constant 1 : index
    %c2_47 = arith.constant 2 : index
    %c0_48 = arith.constant 0 : index
    %99 = vector.load %arg10[%c1_46, %c2_47, %c0_48] : memref<10x10x8xbf16, #tpu.memory_space<vmem>>, vector<8x8x8xbf16>
    %100 = vector.shape_cast %99 : vector<8x8x8xbf16> to vector<64x8xbf16>
    %c2_49 = arith.constant 2 : index
    %c0_50 = arith.constant 0 : index
    %c0_51 = arith.constant 0 : index
    %101 = vector.load %arg10[%c2_49, %c0_50, %c0_51] : memref<10x10x8xbf16, #tpu.memory_space<vmem>>, vector<8x8x8xbf16>
    %102 = vector.shape_cast %101 : vector<8x8x8xbf16> to vector<64x8xbf16>
    %c2_52 = arith.constant 2 : index
    %c1_53 = arith.constant 1 : index
    %c0_54 = arith.constant 0 : index
    %103 = vector.load %arg10[%c2_52, %c1_53, %c0_54] : memref<10x10x8xbf16, #tpu.memory_space<vmem>>, vector<8x8x8xbf16>
    %104 = vector.shape_cast %103 : vector<8x8x8xbf16> to vector<64x8xbf16>
    %c2_55 = arith.constant 2 : index
    %c2_56 = arith.constant 2 : index
    %c0_57 = arith.constant 0 : index
    %105 = vector.load %arg10[%c2_55, %c2_56, %c0_57] : memref<10x10x8xbf16, #tpu.memory_space<vmem>>, vector<8x8x8xbf16>
    %106 = vector.shape_cast %105 : vector<8x8x8xbf16> to vector<64x8xbf16>
    %107 = tpu.concatenate %90, %92, %94, %96, %98, %100, %102, %104, %106 in 1 : vector<64x8xbf16>, vector<64x8xbf16>, vector<64x8xbf16>, vector<64x8xbf16>, vector<64x8xbf16>, vector<64x8xbf16>, vector<64x8xbf16>, vector<64x8xbf16>, vector<64x8xbf16> -> vector<64x72xbf16>
    %c0_58 = arith.constant 0 : index
    %c0_59 = arith.constant 0 : index
    %108 = vector.load %arg4[%c0_58, %c0_59] : memref<72x8xbf16, #tpu.memory_space<vmem>>, vector<72x8xbf16>
    %cst_60 = arith.constant dense<0.000000e+00> : vector<64x8xf32>
    %109 = tpu.matmul %107, %108, %cst_60 {dimension_numbers = #tpu.dot_dimension_numbers<[1], [0], [0], [1], [0, 0, 1, 1], [], []>} : vector<64x72xbf16>, vector<72x8xbf16>, vector<64x8xf32> -> vector<64x8xf32>
    %c0_61 = arith.constant 0 : index
    %c0_62 = arith.constant 0 : index
    %110 = vector.load %arg5[%c0_61, %c0_62] : memref<1x8xf32, #tpu.memory_space<vmem>>, vector<1x8xf32>
    %111 = vector.broadcast %110 : vector<1x8xf32> to vector<64x8xf32>
    %112 = arith.addf %109, %111 : vector<64x8xf32>
    %cst_63 = arith.constant 0.000000e+00 : f32
    %113 = vector.broadcast %cst_63 : f32 to vector<64x8xf32>
    %114 = arith.maximumf %112, %113 : vector<64x8xf32>
    %115 = arith.addf %83, %114 : vector<64x8xf32>
    %cst_64 = arith.constant 0.000000e+00 : f32
    %116 = vector.broadcast %cst_64 : f32 to vector<64x8xf32>
    %117 = arith.maximumf %115, %116 : vector<64x8xf32>
    %118 = vector.shape_cast %117 : vector<64x8xf32> to vector<8x8x8xf32>
    %c0_65 = arith.constant 0 : index
    %c0_66 = arith.constant 0 : index
    %c0_67 = arith.constant 0 : index
    %c0_68 = arith.constant 0 : index
    %119 = vector.load %arg8[%c0_65, %c0_66, %c0_67, %c0_68] : memref<1x8x8x8xf32, #tpu.memory_space<vmem>>, vector<1x8x8x8xf32>
    %120 = vector.shape_cast %119 : vector<1x8x8x8xf32> to vector<8x8x8xf32>
    %121 = vector.shape_cast %118 : vector<8x8x8xf32> to vector<1x8x8x8xf32>
    tpu.vector_store %arg8[%c0_65, %c0_66, %c0_67, %c0_68], %121 {strides = array<i32>} : memref<1x8x8x8xf32, #tpu.memory_space<vmem>>, vector<1x8x8x8xf32>,
    return
  }
  func.func @transform_0(%arg0: i32) -> (i32, i32, i32, i32) {
    %c0_i32 = arith.constant 0 : i32
    %c0_i32_0 = arith.constant 0 : i32
    %c0_i32_1 = arith.constant 0 : i32
    %c0_i32_2 = arith.constant 0 : i32
    return %arg0, %c0_i32, %c0_i32_0, %c0_i32_1 : i32, i32, i32, i32
  }
  func.func @transform_1(%arg0: i32) -> (i32, i32) {
    %c0_i32 = arith.constant 0 : i32
    %c0_i32_0 = arith.constant 0 : i32
    %c0_i32_1 = arith.constant 0 : i32
    return %c0_i32, %c0_i32_0 : i32, i32
  }
  func.func @transform_2(%arg0: i32) -> (i32, i32) {
    %c0_i32 = arith.constant 0 : i32
    %c0_i32_0 = arith.constant 0 : i32
    %c0_i32_1 = arith.constant 0 : i32
    return %c0_i32, %c0_i32_0 : i32, i32
  }
  func.func @transform_3(%arg0: i32) -> (i32, i32) {
    %c0_i32 = arith.constant 0 : i32
    %c0_i32_0 = arith.constant 0 : i32
    %c0_i32_1 = arith.constant 0 : i32
    return %c0_i32, %c0_i32_0 : i32, i32
  }
  func.func @transform_4(%arg0: i32) -> (i32, i32) {
    %c0_i32 = arith.constant 0 : i32
    %c0_i32_0 = arith.constant 0 : i32
    %c0_i32_1 = arith.constant 0 : i32
    return %c0_i32, %c0_i32_0 : i32, i32
  }
  func.func @transform_5(%arg0: i32) -> (i32, i32) {
    %c0_i32 = arith.constant 0 : i32
    %c0_i32_0 = arith.constant 0 : i32
    %c0_i32_1 = arith.constant 0 : i32
    return %c0_i32, %c0_i32_0 : i32, i32
  }
  func.func @transform_6(%arg0: i32) -> (i32, i32) {
    %c0_i32 = arith.constant 0 : i32
    %c0_i32_0 = arith.constant 0 : i32
    %c0_i32_1 = arith.constant 0 : i32
    return %c0_i32, %c0_i32_0 : i32, i32
  }
  func.func @transform_7(%arg0: i32) -> (i32, i32, i32, i32) {
    %c0_i32 = arith.constant 0 : i32
    %c0_i32_0 = arith.constant 0 : i32
    %c0_i32_1 = arith.constant 0 : i32
    %c0_i32_2 = arith.constant 0 : i32
    return %arg0, %c0_i32, %c0_i32_0, %c0_i32_1 : i32, i32, i32, i32
  }
}

</mosaic_0001>

<bundles_post_ra>
// kernel: tpu_custom_call.1
= control target key start
LH: loop header
LB: loop body
LE: loop exit
PB: predicated region body
PF: predicated region fallthrough
CT: control target
= control target key end

     0   :  { %12 = vsyncpa [#allocation5], 0  ;;  %s3609_s0 = inlined_call_operand.vmem [shape: f32[2,16,16,4], index: 0, kind: input, shape index: {}]   ;;  %s3610_s1 = inlined_call_operand.vmem [shape: bf16[36,8], index: 1, kind: input, shape index: {}]   ;;  %s3611_s2 = inlined_call_operand.vmem [shape: f32[1,8], index: 2, kind: input, shape index: {}]   ;;  %s3612_s3 = inlined_call_operand.vmem [shape: bf16[72,8], index: 3, kind: input, shape index: {}]   ;;  %s3613_s4 = inlined_call_operand.vmem [shape: f32[1,8], index: 4, kind: input, shape index: {}]   ;;  %s3614_s5 = inlined_call_operand.vmem [shape: bf16[4,8], index: 5, kind: input, shape index: {}]   ;;  %s3615_s6 = inlined_call_operand.vmem [shape: f32[1,8], index: 6, kind: input, shape index: {}]   ;;  %s3616_s7 = inlined_call_operand.hbm [shape: f32[2,8,8,8], index: 7, kind: output, shape index: {}]  }
   0x1   :  { %14 = vsyncpa [#allocation5 + $0x1], 0  ;;  %s2630_s24 = smov 0   ;;  %s2632_s25 = smov 0  }
   0x2   :  { %s2634_s26 = smov 0   ;;  %s2636_s27 = smov 0  }
   0x3 LB: > { %s2651_s28 = sadd.s32 4294967295, %s2572_s27   ;;  %s2256_s29 = sadd.s32 4294967294, %s2572_s27   ;;  %s2572_s27 = sphi %s2636_s27, %s3632_s27   ;;  %s2568_s26 = sphi %s2634_s26, %s3631_s26   ;;  %s2564_s25 = sphi %s2632_s25, %s3630_s25   ;;  %s2560_s24 = sphi %s2630_s24, %s3629_s24  }
   0x4   : > { %s2655_s30 = sadd.s32 1, %s2572_s27   ;;  %s179_s8 = sadd.s32 1, %s2568_s26 }
   0x5   : > { %s176_s9 = ssub.s32 %s2572_s27, %s2655_s30  ;;  %p189_p0 = scmp.ne.s32.totalorder %s2568_s26, %s2564_s25 }
   0x6   : > { %p177_p1 = scmp.eq.s32.totalorder %s176_s9, 0  ;;  %p190_p2 = scmp.eq.s32.totalorder %s2651_s28, 1 }
   0x7   : > { %p195_p3 = scmp.ne.s32.totalorder %s2564_s25, %s2560_s24  ;;  %p196_p4 = scmp.eq.s32.totalorder %s2256_s29, 1 }
   0x8   : > { %s2666_s10 = scalar_select %p177_p1, %s2568_s26, %s179_s8  }
   0x9   : > { %p2668_p5 = por %p190_p2, %p189_p0  ;;  %p2672_p6 = por %p196_p4, %p195_p3 }
   0xa   : > { %p2259_p7 = scmp.ge.s32.totalorder %s2572_s27, 1  ;;  %p240_p8 = scmp.lt.s32.totalorder %s2572_s27, 3 }
   0xc   : > { %p241_p9 = pnand %p2259_p7, %p240_p8 }
   0xd   : > { %p272_p10 = scmp.lt.s32.totalorder (!%p241_p9), %s2651_s28, 1  ;;  %vm278_vm0 = vcmask (!%p241_p9), 31744   ;;  %vm281_vm1 = vcmask (!%p241_p9), 25600   ;;  %v2574_v0 = vmov (!%p241_p9), 0.0   ;;  %s2575_s18 = smov (!%p241_p9), 12   ;;  %vm516_vm2 = vcmask (!%p241_p9), 1046528  }
   0xe   : > { %244 = sbr.rel (%p241_p9) target bundleno = 884 (0x374), region = 48  ;;  %295 = vst.msk [vmem:[#allocation2 + $0x78] sm:$0xff] (!%p241_p9), %vm278_vm0, %v2574_v0  ;;  %296 = vst.msk [vmem:[#allocation2 + $0x80] sm:$0xff] (!%p241_p9), %vm278_vm0, %v2574_v0  ;;  %s2576_s19 = smov (!%p241_p9), 4   ;;  %vm846_vm3 = vcmask (!%p241_p9), 1041408   ;;  %vm747_vm4 = vcmask (!%p241_p9), 64512  }
   0xf   : > { %297 = vst.msk [vmem:[#allocation2 + $0x88] sm:$0x3] (!%p241_p9), %vm281_vm1, %v2574_v0  ;;  %303 = vst.msk [vmem:[#allocation2 + $0xb8] sm:$0x3] (!%p241_p9), %vm281_vm1, %v2574_v0  ;;  %s2577_s20 = smov (!%p241_p9), 16   ;;  %s2578_s21 = smov (!%p241_p9), 24  }
  0x10   : > { %301 = vst.msk [vmem:[#allocation2 + $0xa8] sm:$0xff] (!%p241_p9), %vm278_vm0, %v2574_v0  ;;  %302 = vst.msk [vmem:[#allocation2 + $0xb0] sm:$0xff] (!%p241_p9), %vm278_vm0, %v2574_v0  ;;  %s2579_s22 = smov (!%p241_p9), 8   ;;  %s2581_s16 = smov (!%p241_p9), 28   ;;  %vm756_vm5 = vcmask (!%p241_p9), 97280   ;;  %vm765_vm6 = vcmask (!%p241_p9), 130048  }
  0x11   : > { %279 = vst.msk [vmem:[#allocation2] sm:$0xff] (!%p241_p9), %vm278_vm0, %v2574_v0  ;;  %280 = vst.msk [vmem:[#allocation2 + $0x8] sm:$0xff] (!%p241_p9), %vm278_vm0, %v2574_v0  ;;  %vm774_vm7 = vcmask (!%p241_p9), 162816   ;;  %vm783_vm8 = vcmask (!%p241_p9), 195584   ;;  %vm792_vm9 = vcmask (!%p241_p9), 228352   ;;  %vm801_vm10 = vcmask (!%p241_p9), 261120  }
  0x12   : > { %282 = vst.msk [vmem:[#allocation2 + $0x10] sm:$0x3] (!%p241_p9), %vm281_vm1, %v2574_v0  ;;  %285 = vst.msk [vmem:[#allocation2 + $0x28] sm:$0x3] (!%p241_p9), %vm281_vm1, %v2574_v0  ;;  %vm837_vm11 = vcmask (!%p241_p9), 293888   ;;  %vm1011_vm12 = vcmask (!%p241_p9), 60416  }
  0x13   : > { %283 = vst.msk [vmem:[#allocation2 + $0x18] sm:$0xff] (!%p241_p9), %vm278_vm0, %v2574_v0  ;;  %284 = vst.msk [vmem:[#allocation2 + $0x20] sm:$0xff] (!%p241_p9), %vm278_vm0, %v2574_v0  ;;  %vm1013_vm13 = vcmask (!%p241_p9), 57344   ;;  %vm1147_vm14 = vsmask.f32 (!%p241_p9), 7938  ;;  %s2584_s23 = smov (!%p241_p9), 48  }
  0x14   : > { %286 = vst.msk [vmem:[#allocation2 + $0x30] sm:$0xff] (!%p241_p9), %vm278_vm0, %v2574_v0  ;;  %287 = vst.msk [vmem:[#allocation2 + $0x38] sm:$0xff] (!%p241_p9), %vm278_vm0, %v2574_v0  ;;  %vm1153_vm15 = vsmask.f32 (!%p241_p9), 256  ;;  %s2585_s29 = smov (!%p241_p9), 40   ;;  %s2588_s9 = smov (!%p241_p9), [#allocation4]  }
  0x15   : > { %288 = vst.msk [vmem:[#allocation2 + $0x40] sm:$0x3] %vm281_vm1, %v2574_v0  ;;  %291 = vst.msk [vmem:[#allocation2 + $0x58] sm:$0x3] %vm281_vm1, %v2574_v0  ;;  %s273_s13 = scalar_select %p272_p10, %s2651_s28, 1 }
  0x16   : > { %289 = vst.msk [vmem:[#allocation2 + $0x48] sm:$0xff] %vm278_vm0, %v2574_v0  ;;  %290 = vst.msk [vmem:[#allocation2 + $0x50] sm:$0xff] %vm278_vm0, %v2574_v0 }
  0x17   : > { %292 = vst.msk [vmem:[#allocation2 + $0x60] sm:$0xff] %vm278_vm0, %v2574_v0  ;;  %293 = vst.msk [vmem:[#allocation2 + $0x68] sm:$0xff] %vm278_vm0, %v2574_v0  ;;  %s2359_s14 = sshll.u32 %s273_s13, 8  ;;  %s2580_s13 = smov 20  }
  0x18   : > { %294 = vst.msk [vmem:[#allocation2 + $0x70] sm:$0x3] %vm281_vm1, %v2574_v0  ;;  %300 = vst.msk [vmem:[#allocation2 + $0xa0] sm:$0x3] %vm281_vm1, %v2574_v0  ;;  %s2736_s17 = scalar_lea.vmem %s3609_s0, %s2359_s14  ;;  %v467_v15 = vld [vmem:[#allocation2 + $0x1] ss:$2 sm:$0xff] }
  0x19   : > { %298 = vst.msk [vmem:[#allocation2 + $0x90] sm:$0xff] %vm278_vm0, %v2574_v0  ;;  %299 = vst.msk [vmem:[#allocation2 + $0x98] sm:$0xff] %vm278_vm0, %v2574_v0  ;;  %v342_v1 = vld [vmem:[%s2736_s17 + $0x40] sm:$0xff]  ;;  %v343_v2 = vld [vmem:[%s2736_s17 + $0x48] sm:$0xff]  ;;  %s269_s14 = sand.u32 1, %s2564_s25  }
  0x1a   : > { %304 = vst.msk [vmem:[#allocation2 + $0xc0] sm:$0xff] %vm278_vm0, %v2574_v0  ;;  %305 = vst.msk [vmem:[#allocation2 + $0xc8] sm:$0xff] %vm278_vm0, %v2574_v0  ;;  %v346_v3 = vld [vmem:[%s2736_s17 + $0x60] sm:$0xff]  ;;  %v347_v4 = vld [vmem:[%s2736_s17 + $0x68] sm:$0xff]  ;;  %s2260_s15 = sshll.u32 %s269_s14, 6 }
  0x1b   : > { %306 = vst.msk [vmem:[#allocation2 + $0xd0] sm:$0x3] %vm281_vm1, %v2574_v0  ;;  %309 = vst.msk [vmem:[#allocation2 + $0xe8] sm:$0x3] %vm281_vm1, %v2574_v0  ;;  %v336_v5 = vld [vmem:[%s2736_s17 + $0x10] sm:$0xff]  ;;  %v337_v6 = vld [vmem:[%s2736_s17 + $0x18] sm:$0xff] }
  0x1c   : > { %307 = vst.msk [vmem:[#allocation2 + $0xd8] sm:$0xff] %vm278_vm0, %v2574_v0  ;;  %308 = vst.msk [vmem:[#allocation2 + $0xe0] sm:$0xff] %vm278_vm0, %v2574_v0  ;;  %v340_v7 = vld [vmem:[%s2736_s17 + $0x30] sm:$0xff]  ;;  %v341_v8 = vld [vmem:[%s2736_s17 + $0x38] sm:$0xff] }
  0x1d   : > { %310 = vst.msk [vmem:[#allocation2 + $0xf0] sm:$0xff] %vm278_vm0, %v2574_v0  ;;  %311 = vst.msk [vmem:[#allocation2 + $0xf8] sm:$0xff] %vm278_vm0, %v2574_v0  ;;  %v344_v9 = vld [vmem:[%s2736_s17 + $0x50] sm:$0xff]  ;;  %v345_v10 = vld [vmem:[%s2736_s17 + $0x58] sm:$0xff] }
  0x1e   : > { %312 = vst.msk [vmem:[#allocation2 + $0x100] sm:$0x3] %vm281_vm1, %v2574_v0  ;;  %315 = vst.msk [vmem:[#allocation2 + $0x118] sm:$0x3] %vm281_vm1, %v2574_v0  ;;  %v348_v11 = vld [vmem:[%s2736_s17 + $0x70] sm:$0xff]  ;;  %v349_v12 = vld [vmem:[%s2736_s17 + $0x78] sm:$0xff] }
  0x1f   : > { %313 = vst.msk [vmem:[#allocation2 + $0x108] sm:$0xff] %vm278_vm0, %v2574_v0  ;;  %314 = vst.msk [vmem:[#allocation2 + $0x110] sm:$0xff] %vm278_vm0, %v2574_v0  ;;  %v334_v13 = vld [vmem:[%s2736_s17] sm:$0xff]  ;;  %v335_v14 = vld [vmem:[%s2736_s17 + $0x8] sm:$0xff] }
  0x20   : > { %316 = vst.msk [vmem:[#allocation2 + $0x120] sm:$0xff] %vm278_vm0, %v2574_v0  ;;  %317 = vst.msk [vmem:[#allocation2 + $0x128] sm:$0xff] %vm278_vm0, %v2574_v0  ;;  %v338_v16 = vld [vmem:[%s2736_s17 + $0x20] sm:$0xff]  ;;  %v339_v17 = vld [vmem:[%s2736_s17 + $0x28] sm:$0xff] }
  0x21   : > { %318 = vst.msk [vmem:[#allocation2 + $0x130] sm:$0x3] %vm281_vm1, %v2574_v0  ;;  %321 = vst.msk [vmem:[#allocation2 + $0x148] sm:$0x3] %vm281_vm1, %v2574_v0  ;;  %v2770_v18 = vld [vmem:[#allocation2] ss:$2 sm:$0xff] }
  0x22   : > { %319 = vst.msk [vmem:[#allocation2 + $0x138] sm:$0xff] %vm278_vm0, %v2574_v0  ;;  %320 = vst.msk [vmem:[#allocation2 + $0x140] sm:$0xff] %vm278_vm0, %v2574_v0  ;;  %v352_v19 = vld [vmem:[%s2736_s17 + $0x90] sm:$0xff]  ;;  %v353_v20 = vld [vmem:[%s2736_s17 + $0x98] sm:$0xff]  ;;  %v517_v38 = vrot.slane %v2770_v18, 1 }
  0x23   : > { %322 = vst.msk [vmem:[#allocation2 + $0x150] sm:$0xff] %vm278_vm0, %v2574_v0  ;;  %323 = vst.msk [vmem:[#allocation2 + $0x158] sm:$0xff] %vm278_vm0, %v2574_v0  ;;  %v356_v21 = vld [vmem:[%s2736_s17 + $0xb0] sm:$0xff]  ;;  %v357_v22 = vld [vmem:[%s2736_s17 + $0xb8] sm:$0xff] }
  0x24   : > { %324 = vst.msk [vmem:[#allocation2 + $0x160] sm:$0x3] %vm281_vm1, %v2574_v0  ;;  %327 = vst.msk [vmem:[#allocation2 + $0x178] sm:$0x3] %vm281_vm1, %v2574_v0  ;;  %v360_v23 = vld [vmem:[%s2736_s17 + $0xd0] sm:$0xff]  ;;  %v361_v27 = vld [vmem:[%s2736_s17 + $0xd8] sm:$0xff] }
  0x25   : > { %325 = vst.msk [vmem:[#allocation2 + $0x168] sm:$0xff] %vm278_vm0, %v2574_v0  ;;  %326 = vst.msk [vmem:[#allocation2 + $0x170] sm:$0xff] %vm278_vm0, %v2574_v0  ;;  %v401_v26 = vld [vmem:[#allocation2 + $0x10] ss:$2 sm:$0x1]  ;;  %v358_v30 = vld [vmem:[%s2736_s17 + $0xc0] sm:$0xff] }
  0x26   : > { %328 = vst.msk [vmem:[#allocation2 + $0x180] sm:$0xff] %vm278_vm0, %v2574_v0  ;;  %329 = vst.msk [vmem:[#allocation2 + $0x188] sm:$0xff] %vm278_vm0, %v2574_v0  ;;  %v359_v35 = vld [vmem:[%s2736_s17 + $0xc8] sm:$0xff]  ;;  %v518_v46 = vrot.slane %v401_v26, 1  ;;  %v362_v60 = vld [vmem:[%s2736_s17 + $0xe0] sm:$0xff] }
  0x27   : > { %330 = vst.msk [vmem:[#allocation2 + $0x190] sm:$0x3] %vm281_vm1, %v2574_v0  ;;  %v350_v26 = vld [vmem:[%s2736_s17 + $0x80] sm:$0xff]  ;;  %vm3033_vm1 = vmand %vm1011_vm12, %vm1147_vm14  ;;  %vm2000_vm14 = vcmask 392192  }
  0x28   : > { %375 = vst.msk [vmem:[#allocation2 + $0x79] sm:$0xff] %vm278_vm0, %v342_v1  ;;  %376 = vst.msk [vmem:[#allocation2 + $0x81] sm:$0xff] %vm278_vm0, %v343_v2  ;;  %v519_v63 = vsel %vm516_vm2, %v517_v38, %v518_v46 }
  0x29   : > { %379 = vst.msk [vmem:[#allocation2 + $0xa9] sm:$0xff] %vm278_vm0, %v346_v3  ;;  %380 = vst.msk [vmem:[#allocation2 + $0xb1] sm:$0xff] %vm278_vm0, %v347_v4 }
  0x2a   : > { %369 = vst.msk [vmem:[#allocation2 + $0x31] sm:$0xff] %vm278_vm0, %v336_v5  ;;  %370 = vst.msk [vmem:[#allocation2 + $0x39] sm:$0xff] %vm278_vm0, %v337_v6 }
  0x2b   : > { %373 = vst.msk [vmem:[#allocation2 + $0x61] sm:$0xff] %vm278_vm0, %v340_v7  ;;  %374 = vst.msk [vmem:[#allocation2 + $0x69] sm:$0xff] %vm278_vm0, %v341_v8 }
  0x2c   : > { %377 = vst.msk [vmem:[#allocation2 + $0x91] sm:$0xff] %vm278_vm0, %v344_v9  ;;  %378 = vst.msk [vmem:[#allocation2 + $0x99] sm:$0xff] %vm278_vm0, %v345_v10 }
  0x2d   : > { %381 = vst.msk [vmem:[#allocation2 + $0xc1] sm:$0xff] %vm278_vm0, %v348_v11  ;;  %382 = vst.msk [vmem:[#allocation2 + $0xc9] sm:$0xff] %vm278_vm0, %v349_v12 }
  0x2e   : > { %367 = vst.msk [vmem:[#allocation2 + $0x19] sm:$0xff] %vm278_vm0, %v334_v13  ;;  %368 = vst.msk [vmem:[#allocation2 + $0x21] sm:$0xff] %vm278_vm0, %v335_v14 }
  0x2f   : > { %371 = vst.msk [vmem:[#allocation2 + $0x49] sm:$0xff] %vm278_vm0, %v338_v16  ;;  %372 = vst.msk [vmem:[#allocation2 + $0x51] sm:$0xff] %vm278_vm0, %v339_v17  ;;  %v2779_v24 = vld [vmem:[#allocation2 + $0x78] ss:$2 sm:$0xff]  ;;  %v477_v25 = vld [vmem:[#allocation2 + $0x79] ss:$2 sm:$0xff] }
  0x30   : > { %385 = vst.msk [vmem:[#allocation2 + $0xf1] sm:$0xff] %vm278_vm0, %v352_v19  ;;  %386 = vst.msk [vmem:[#allocation2 + $0xf9] sm:$0xff] %vm278_vm0, %v353_v20  ;;  %v2785_v28 = vld [vmem:[#allocation2 + $0xa8] ss:$2 sm:$0xff]  ;;  %v481_v34 = vld [vmem:[#allocation2 + $0xa9] ss:$2 sm:$0xff] }
  0x31   : > { %389 = vst.msk [vmem:[#allocation2 + $0x121] sm:$0xff] %vm278_vm0, %v356_v21  ;;  %390 = vst.msk [vmem:[#allocation2 + $0x129] sm:$0xff] %vm278_vm0, %v357_v22  ;;  %v2787_v29 = vld [vmem:[#allocation2 + $0x31] ss:$2 sm:$0xff]  ;;  %v616_v31 = vpack.c.bf16 %v2785_v28, %v2779_v24  ;;  %v2800_v37 = vld [vmem:[#allocation2 + $0x30] ss:$2 sm:$0xff]  ;;  %v2806_v39 = vpack.c.bf16 %v481_v34, %v477_v25 }
  0x32   : > { %393 = vst.msk [vmem:[#allocation2 + $0x151] sm:$0xff] %vm278_vm0, %v360_v23  ;;  %394 = vst.msk [vmem:[#allocation2 + $0x159] sm:$0xff] %vm278_vm0, %v361_v27  ;;  %v2793_v32 = vld [vmem:[#allocation2 + $0x61] ss:$2 sm:$0xff]  ;;  %v607_v33 = vpack.c.bf16 %v2787_v29, %v467_v15  ;;  %v603_v44 = vpack.c.bf16 %v2800_v37, %v2770_v18  ;;  %v520_v47 = vrot.slane %v2800_v37, 1  ;;  %v574_v4 = vrot.slane %v2785_v28, 1 }
  0x33   : > { %391 = vst.msk [vmem:[#allocation2 + $0x139] sm:$0xff] %vm278_vm0, %v358_v30  ;;  %v2798_v36 = vld [vmem:[#allocation2 + $0x91] ss:$2 sm:$0xff]  ;;  %392 = vst.msk [vmem:[#allocation2 + $0x141] sm:$0xff] %vm278_vm0, %v359_v35  ;;  %669 = vrot.lane.b32.xlu1 %v616_v31, %s2575_s18  ;;  %v2810_v41 = vld [vmem:[#allocation2 + $0x90] ss:$2 sm:$0xff] }
  0x34   : > { %643 = vrot.lane.b32.xlu0 %v607_v33, %s2576_s19  ;;  %v608_v40 = vpack.c.bf16 %v2798_v36, %v2793_v32  ;;  %v2812_v42 = vld [vmem:[#allocation2 + $0xc0] ss:$2 sm:$0xff]  ;;  %v417_v55 = vld [vmem:[#allocation2 + $0x70] ss:$2 sm:$0x1]  ;;  %v526_v62 = vrot.slane %v2810_v41, 1 }
  0x35   : > { %v403_v43 = vld [vmem:[#allocation2 + $0x18] ss:$2 sm:$0xff]  ;;  %v469_v48 = vld [vmem:[#allocation2 + $0x19] ss:$2 sm:$0xff]  ;;  %v628_v51 = vpack.c.bf16 %v2812_v42, %v2810_v41  ;;  %v524_v59 = vrot.slane %v417_v55, 1  ;;  %395 = vst.msk [vmem:[#allocation2 + $0x169] sm:$0xff] %vm278_vm0, %v362_v60 }
  0x36   : > { %v411_v45 = vld [vmem:[#allocation2 + $0x48] ss:$2 sm:$0xff]  ;;  %v409_v49 = vld [vmem:[#allocation2 + $0x40] ss:$2 sm:$0x1]  ;;  %v571_v5 = vrot.slane %v2779_v24, 1 }
  0x37   : > { %v473_v50 = vld [vmem:[#allocation2 + $0x49] ss:$2 sm:$0xff]  ;;  %v521_v52 = vrot.slane %v409_v49, 1  ;;  %v2819_v54 = vld [vmem:[#allocation2 + $0x60] ss:$2 sm:$0xff]  ;;  %681 = vrot.lane.b32.xlu1 %v2806_v39, %s2577_s20  ;;  %v615_v56 = vpack.c.bf16 %v411_v45, %v403_v43  ;;  %v565_v6 = vrot.slane %v403_v43, 1 }
  0x38   : > { %v619_v53 = vpack.c.bf16 %v473_v50, %v469_v48  ;;  %645 = vrot.lane.b32.xlu0 %v608_v40, %s2576_s19  ;;  %v425_v57 = vld [vmem:[#allocation2 + $0xa0] ss:$2 sm:$0x1]  ;;  %v523_v58 = vrot.slane %v2819_v54, 1  ;;  %v604_v61 = vpack.c.bf16 %v2810_v41, %v2819_v54  ;;  %v568_v8 = vrot.slane %v411_v45, 1  ;;  %v363_v25 = vld [vmem:[%s2736_s17 + $0xe8] sm:$0xff] }
  0x39   : > { %v2831_v0 = vsel %vm516_vm2, %v520_v47, %v521_v52  ;;  %v527_v1 = vrot.slane %v425_v57, 1  ;;  %v421_v2 = vld [vmem:[#allocation2 + $0x88] ss:$2 sm:$0x1]  ;;  %v627_v19 = vpack.c.bf16 %v2819_v54, %v2800_v37  ;;  %v2856_v24 = vld [vmem:[#allocation2 + $0xf0] ss:$2 sm:$0xff] }
  0x3a   : > { %2406 = vmatprep.mubr.msk.bf16.mxu1 %vm278_vm0, %v619_v53  ;;  %v429_v3 = vld [vmem:[#allocation2 + $0xb8] ss:$2 sm:$0x1]  ;;  %v405_v7 = vld [vmem:[#allocation2 + $0x28] ss:$2 sm:$0x1]  ;;  %v611_v9 = vpack.c.bf16 %v2831_v0, %v519_v63  ;;  %v2841_v10 = vsel %vm516_vm2, %v523_v58, %v524_v59  ;;  %v605_v33 = vpack.c.bf16 %v2856_v24, %v2812_v42 }
  0x3b   : > { %705 = vrot.lane.b32.xlu1 %v628_v51, %s2578_s21  ;;  %v572_v11 = vrot.slane %v421_v2, 1  ;;  %v413_v12 = vld [vmem:[#allocation2 + $0x58] ss:$2 sm:$0x1]  ;;  %v2844_v13 = vsel %vm516_vm2, %v526_v62, %v527_v1  ;;  %v575_v14 = vrot.slane %v429_v3, 1  ;;  %v566_v15 = vrot.slane %v405_v7, 1 }
  0x3c   : > { %667 = vrot.lane.b32.xlu0 %v615_v56, %s2575_s18  ;;  %v569_v16 = vrot.slane %v413_v12, 1  ;;  %v612_v17 = vpack.c.bf16 %v2844_v13, %v2841_v10  ;;  %396 = vst.msk [vmem:[#allocation2 + $0x171] sm:$0xff] %vm278_vm0, %v363_v25  ;;  %v351_v27 = vld [vmem:[%s2736_s17 + $0x88] sm:$0xff]  ;;  %v354_v28 = vld [vmem:[%s2736_s17 + $0xa0] sm:$0xff]  ;;  %383 = vst.msk [vmem:[#allocation2 + $0xd9] sm:$0xff] %vm278_vm0, %v350_v26  ;;  %v631_v51 = vpack.c.bf16 %v2793_v32, %v2787_v29  ;;  %v529_v55 = vrot.slane %v2812_v42, 1 }
  0x3d   : > { %v573_v20 = vsel %vm516_vm2, %v571_v5, %v572_v11  ;;  %v576_v21 = vsel %vm516_vm2, %v574_v4, %v575_v14  ;;  %v567_v22 = vsel %vm516_vm2, %v565_v6, %v566_v15  ;;  %v355_v30 = vld [vmem:[%s2736_s17 + $0xa8] sm:$0xff]  ;;  %384 = vst.msk [vmem:[#allocation2 + $0xe1] sm:$0xff] %vm278_vm0, %v351_v27  ;;  %387 = vst.msk [vmem:[#allocation2 + $0x109] sm:$0xff] %vm278_vm0, %v354_v28  ;;  %v364_v31 = vld [vmem:[%s2736_s17 + $0xf0] sm:$0xff]  ;;  %v532_v4 = vrot.slane %v2856_v24, 1 }
  0x3e   : > { %v570_v23 = vsel %vm516_vm2, %v568_v8, %v569_v16  ;;  %388 = vst.msk [vmem:[#allocation2 + $0x111] sm:$0xff] %vm278_vm0, %v355_v30  ;;  %v624_v34 = vpack.c.bf16 %v576_v21, %v573_v20  ;;  %v483_v38 = vld [vmem:[#allocation2 + $0xc1] ss:$2 sm:$0xff]  ;;  %v365_v40 = vld [vmem:[%s2736_s17 + $0xf8] sm:$0xff]  ;;  %397 = vst.msk [vmem:[#allocation2 + $0x181] sm:$0xff] %vm278_vm0, %v364_v31  ;;  %v635_v32 = vpack.c.bf16 %v2841_v10, %v2831_v0  ;;  %s2582_s17 = smov 32  }
  0x3f   : > { %655 = vrot.lane.b32.xlu1 %v611_v9, %s2579_s22  ;;  %v623_v35 = vpack.c.bf16 %v570_v23, %v567_v22  ;;  %v2489_v43 = vld [vmem:[%s3610_s1] sm:$0xff]   ;;  %v2880_v46 = vld [vmem:[#allocation2 + $0x150] ss:$2 sm:$0xff]  ;;  %398 = vst.msk [vmem:[#allocation2 + $0x189] sm:$0xff] %vm278_vm0, %v365_v40  ;;  %v2490_v47 = vld [vmem:[%s3610_s1 + $0x8] sm:$0xff]   ;;  %v632_v52 = vpack.c.bf16 %v483_v38, %v2798_v36 }
  0x40   : > { %679 = vrot.lane.b32.xlu0 %v619_v53, %s2577_s20  ;;  %v2878_v45 = vld [vmem:[#allocation2 + $0x120] ss:$2 sm:$0xff]  ;;  %v2886_v48 = vld [vmem:[#allocation2 + $0xf1] ss:$2 sm:$0xff]  ;;  %2390 = vmatprep.subr.bf16.mxu0 %v2489_v43  ;;  %v2904_v36 = vld [vmem:[#allocation2 + $0x121] ss:$2 sm:$0xff] }
  0x41   : > { %v433_v49 = vld [vmem:[#allocation2 + $0xd0] ss:$2 sm:$0x1]  ;;  %v606_v50 = vpack.c.bf16 %v2880_v46, %v2878_v45  ;;  %2391 = vmatpush3.bf16.msra.mxu0 %v2489_v43  ;;  %v457_v58 = vld [vmem:[#allocation2 + $0x160] ss:$2 sm:$0x1]  ;;  %v609_v29 = vpack.c.bf16 %v2886_v48, %v483_v38 }
  0x42   : > { %v2491_v53 = vld [vmem:[%s3610_s1 + $0x10] ss:$0 sps:$4 sm:$0x33]   ;;  %v530_v56 = vrot.slane %v433_v49, 1  ;;  %2392 = vmatprep.subr.bf16.mxu0 %v2490_v47  ;;  %v535_v60 = vrot.slane %v2878_v45, 1  ;;  %v538_v63 = vrot.slane %v2880_v46, 1 }
  0x43   : > { %657 = vrot.lane.b32.xlu1 %v612_v17, %s2579_s22  ;;  %v449_v57 = vld [vmem:[#allocation2 + $0x130] ss:$2 sm:$0x1]  ;;  %v441_v59 = vld [vmem:[#allocation2 + $0x100] ss:$2 sm:$0x1] }
  0x44   : > { %703 = vrot.lane.b32.xlu0 %v627_v19, %s2578_s21  ;;  %v536_v62 = vrot.slane %v449_v57, 1  ;;  %v848_v1 = vsel %vm846_vm3, %v2491_v53, 0  ;;  %v2909_v2 = vld [vmem:[#allocation2 + $0x151] ss:$2 sm:$0xff]  ;;  %v531_v3 = vsel %vm516_vm2, %v529_v55, %v530_v56  ;;  %v539_v0 = vrot.slane %v457_v58, 1 }
  0x45   : > { %2393 = vmatpush3.bf16.msra.mxu0 %v2490_v47  ;;  %v533_v5 = vrot.slane %v441_v59, 1  ;;  %v610_v6 = vpack.c.bf16 %v2909_v2, %v2904_v36  ;;  %v636_v7 = vpack.c.bf16 %v531_v3, %v2844_v13  ;;  %v453_v11 = vld [vmem:[#allocation2 + $0x148] ss:$2 sm:$0x1]  ;;  %v451_v15 = vld [vmem:[#allocation2 + $0x138] ss:$2 sm:$0xff] }
  0x46   : > { %2432 = vmatprep.subr.msk.bf16.mxu0 %vm846_vm3, %v2491_v53  ;;  %v537_v8 = vsel %vm516_vm2, %v535_v60, %v536_v62  ;;  %v540_v9 = vsel %vm516_vm2, %v538_v63, %v539_v0  ;;  %v459_v16 = vld [vmem:[#allocation2 + $0x168] ss:$2 sm:$0xff]  ;;  %v435_v17 = vld [vmem:[#allocation2 + $0xd8] ss:$2 sm:$0xff]  ;;  %v583_v22 = vrot.slane %v451_v15, 1  ;;  %v584_v25 = vrot.slane %v453_v11, 1 }
  0x47   : > { %693 = vrot.lane.b32.xlu1 %v624_v34, %s2580_s13  ;;  %v534_v10 = vsel %vm516_vm2, %v532_v4, %v533_v5  ;;  %v614_v12 = vpack.c.bf16 %v540_v9, %v537_v8  ;;  %v443_v19 = vld [vmem:[#allocation2 + $0x108] ss:$2 sm:$0xff]  ;;  %v461_v20 = vld [vmem:[#allocation2 + $0x178] ss:$2 sm:$0x1]  ;;  %v586_v26 = vrot.slane %v459_v16, 1  ;;  %v618_v27 = vpack.c.bf16 %v459_v16, %v451_v15 }
  0x48   : > { %691 = vrot.lane.b32.xlu0 %v623_v35, %s2580_s13  ;;  %v613_v14 = vpack.c.bf16 %v534_v10, %v531_v3  ;;  %v437_v21 = vld [vmem:[#allocation2 + $0xe8] ss:$2 sm:$0x1]  ;;  %v445_v13 = vld [vmem:[#allocation2 + $0x118] ss:$2 sm:$0x1]  ;;  %v617_v30 = vpack.c.bf16 %v443_v19, %v435_v17  ;;  %v629_v60 = vpack.c.bf16 %v2878_v45, %v2856_v24  ;;  %v633_v0 = vpack.c.bf16 %v2904_v36, %v2886_v48 }
  0x49   : > { %2395 = vmatpush3.bf16.msra.mxu0 %v848_v1  ;;  %v493_v23 = vld [vmem:[#allocation2 + $0x139] ss:$2 sm:$0xff]  ;;  %v577_v28 = vrot.slane %v435_v17, 1  ;;  %v497_v31 = vld [vmem:[#allocation2 + $0x169] ss:$2 sm:$0xff]  ;;  %v580_v35 = vrot.slane %v443_v19, 1 }
  0x4a   : > { %v485_v34 = vld [vmem:[#allocation2 + $0xd9] ss:$2 sm:$0xff]  ;;  %v489_v38 = vld [vmem:[#allocation2 + $0x109] ss:$2 sm:$0xff]  ;;  %v587_v40 = vrot.slane %v461_v20, 1  ;;  %v578_v43 = vrot.slane %v437_v21, 1  ;;  %v2928_v49 = vpack.c.bf16 %v497_v31, %v493_v23 }
  0x4b   : > { %717 = vrot.lane.b32.xlu1 %v632_v52, %s2581_s16  ;;  %v581_v47 = vrot.slane %v445_v13, 1  ;;  %v585_v52 = vsel %vm516_vm2, %v583_v22, %v584_v25  ;;  %v463_v59 = vld [vmem:[#allocation2 + $0x180] ss:$2 sm:$0xff]  ;;  %v499_v63 = vld [vmem:[#allocation2 + $0x181] ss:$2 sm:$0xff] }
  0x4c   : > { %715 = vrot.lane.b32.xlu0 %v631_v51, %s2581_s16  ;;  %v2930_v51 = vpack.c.bf16 %v489_v38, %v485_v34  ;;  %v588_v53 = vsel %vm516_vm2, %v586_v26, %v587_v40  ;;  %v579_v55 = vsel %vm516_vm2, %v577_v28, %v578_v43  ;;  %v599_v62 = vrot.slane %v463_v59, 1 }
  0x4d   : > { %v582_v56 = vsel %vm516_vm2, %v580_v35, %v581_v47  ;;  %v626_v57 = vpack.c.bf16 %v588_v53, %v585_v52  ;;  %v634_v3 = vpack.c.bf16 %v499_v63, %v2909_v2 }
  0x4e   : > { %v625_v58 = vpack.c.bf16 %v582_v56, %v579_v55 }
  0x4f   : > { %647 = vrot.lane.b32.xlu1 %v609_v29, %s2576_s19  ;;  %v465_v29 = vld [vmem:[#allocation2 + $0x190] ss:$2 sm:$0x1] }
  0x50   : > { %727 = vrot.lane.b32.xlu0 %v635_v32, %s2582_s17  ;;  %v630_v32 = vpack.c.bf16 %v463_v59, %v2880_v46  ;;  %v600_v1 = vrot.slane %v465_v29, 1 }
  0x52   : > { %v601_v4 = vsel %vm516_vm2, %v599_v62, %v600_v1  ;;  %vm3038_vm2 = vmand %vm1013_vm13, %vm1153_vm15  ;;  %vm2009_vm15 = vcmask 457728  }
  0x53   : > { %649 = vrot.lane.b32.xlu1 %v610_v6, %s2576_s19  ;;  %v638_v5 = vpack.c.bf16 %v601_v4, %v540_v9  ;;  %v637_v6 = vpack.c.bf16 %v537_v8, %v534_v10 }
  0x54   : > { %729 = vrot.lane.b32.xlu0 %v636_v7, %s2582_s17 }
  0x57   : > { %661 = vrot.lane.b32.xlu1 %v614_v12, %s2579_s22 }
  0x58   : > { %659 = vrot.lane.b32.xlu0 %v613_v14, %s2579_s22 }
  0x5b   : > { %673 = vrot.lane.b32.xlu1 %v618_v27, %s2575_s18 }
  0x5c   : > { %671 = vrot.lane.b32.xlu0 %v617_v30, %s2575_s18 }
  0x5f   : > { %685 = vrot.lane.b32.xlu1 %v2928_v49, %s2577_s20 }
  0x60   : > { %683 = vrot.lane.b32.xlu0 %v2930_v51, %s2577_s20 }
  0x63   : > { %697 = vrot.lane.b32.xlu1 %v626_v57, %s2580_s13 }
  0x64   : > { %695 = vrot.lane.b32.xlu0 %v625_v58, %s2580_s13  ;;  %s2586_s13 = smov 64  }
  0x67   : > { %709 = vrot.lane.b32.xlu1 %v630_v32, %s2578_s21 }
  0x68   : > { %707 = vrot.lane.b32.xlu0 %v629_v60, %s2578_s21 }
  0x6b   : > { %721 = vrot.lane.b32.xlu1 %v634_v3, %s2581_s16 }
  0x6c   : > { %719 = vrot.lane.b32.xlu0 %v633_v0, %s2581_s16  ;;  %s3538_s16 = scalar_lea.vmem [#allocation4], %s2260_s15 }
  0x6d   : > { %s2194_s18 = sshll.u32 %s3538_s16, 4  ;;  %s3559_s18 = int_to_ptr.vmem [resolvable:$true] %s2194_s18 }
  0x6e   : > { %s2510_s8 = scalar_lea.vmem %s3559_s18, 1024 }
  0x6f   : > { %733 = vrot.lane.b32.xlu1 %v638_v5, %s2582_s17  ;;  %p2511_p11 = scmp.ne.s32.totalorder %s3559_s18, %s2510_s8 }
  0x70   : > { %731 = vrot.lane.b32.xlu0 %v637_v6, %s2582_s17 }
  0x71   : > { %p2512_p12 = pnand %p2511_p11, %p2668_p5 }
  0x73   : > { %p2513_p13 = pneg %p2512_p12 }
  0xa5   : > { %v670_v7 = vpop.permute.xlu1 %669 }
  0xa6   : > { %v644_v11 = vpop.permute.xlu0 %643 }
  0xa7   : > { %v737_v36 = vsel %vm278_vm0, %v603_v44, %v644_v11 }
  0xa9   : > { %v682_v12 = vpop.permute.xlu1 %681 }
  0xaa   : > { %v646_v14 = vpop.permute.xlu0 %645 }
  0xab   : > { %v740_v17 = vsel %vm278_vm0, %v604_v61, %v646_v14  ;;  %v2583_v14 = vmov 0  }
  0xac   : > { %1019 = vst.msk [vmem:[#allocation3 + $0x18] sm:$0xf] %vm1011_vm12, %v2583_v14  ;;  %1012 = vst.msk [vmem:[#allocation3] sm:$0xf] %vm1011_vm12, %v2583_v14 }
  0xad   : > { %v706_v2 = vpop.permute.xlu1 %705  ;;  %1020 = vst.msk [vmem:[#allocation3 + $0x1c] sm:$0x1] %vm1013_vm13, %v2583_v14  ;;  %1014 = vst.msk [vmem:[#allocation3 + $0x4] sm:$0x1] %vm1013_vm13, %v2583_v14 }
  0xae   : > { %v668_v15 = vpop.permute.xlu0 %667  ;;  %1015 = vst.msk [vmem:[#allocation3 + $0x8] sm:$0xf] %vm1011_vm12, %v2583_v14  ;;  %1017 = vst.msk [vmem:[#allocation3 + $0x10] sm:$0xf] %vm1011_vm12, %v2583_v14 }
  0xaf   : > { %1016 = vst.msk [vmem:[#allocation3 + $0xc] sm:$0x1] %vm1013_vm13, %v2583_v14  ;;  %1018 = vst.msk [vmem:[#allocation3 + $0x14] sm:$0x1] %vm1013_vm13, %v2583_v14 }
  0xb0   : > { %1021 = vst.msk [vmem:[#allocation3 + $0x20] sm:$0xf] %vm1011_vm12, %v2583_v14  ;;  %1023 = vst.msk [vmem:[#allocation3 + $0x28] sm:$0xf] %vm1011_vm12, %v2583_v14 }
  0xb1   : > { %v656_v16 = vpop.permute.xlu1 %655  ;;  %1022 = vst.msk [vmem:[#allocation3 + $0x24] sm:$0x1] %vm1013_vm13, %v2583_v14  ;;  %1024 = vst.msk [vmem:[#allocation3 + $0x2c] sm:$0x1] %vm1013_vm13, %v2583_v14 }
  0xb2   : > { %v680_v48 = vpop.permute.xlu0 %679  ;;  %v749_v10 = vsel %vm747_vm4, %v737_v36, %v656_v16  ;;  %1025 = vst.msk [vmem:[#allocation3 + $0x30] sm:$0xf] %vm1011_vm12, %v2583_v14  ;;  %1027 = vst.msk [vmem:[#allocation3 + $0x38] sm:$0xf] %vm1011_vm12, %v2583_v14 }
  0xb3   : > { %v758_v20 = vsel %vm756_vm5, %v749_v10, %v668_v15  ;;  %1026 = vst.msk [vmem:[#allocation3 + $0x34] sm:$0x1] %vm1013_vm13, %v2583_v14  ;;  %1028 = vst.msk [vmem:[#allocation3 + $0x3c] sm:$0x1] %vm1013_vm13, %v2583_v14 }
  0xb4   : > { %v767_v37 = vsel %vm765_vm6, %v758_v20, %v680_v48  ;;  %1029 = vst.msk [vmem:[#allocation3 + $0x40] sm:$0xf] %vm1011_vm12, %v2583_v14  ;;  %1031 = vst.msk [vmem:[#allocation3 + $0x48] sm:$0xf] %vm1011_vm12, %v2583_v14 }
  0xb5   : > { %v658_v9 = vpop.permute.xlu1 %657  ;;  %1030 = vst.msk [vmem:[#allocation3 + $0x44] sm:$0x1] %vm1013_vm13, %v2583_v14  ;;  %1032 = vst.msk [vmem:[#allocation3 + $0x4c] sm:$0x1] %vm1013_vm13, %v2583_v14 }
  0xb6   : > { %v704_v8 = vpop.permute.xlu0 %703  ;;  %v751_v19 = vsel %vm747_vm4, %v740_v17, %v658_v9 }
  0xb7   : > { %v760_v18 = vsel %vm756_vm5, %v751_v19, %v670_v7 }
  0xb8   : > { %v769_v41 = vsel %vm765_vm6, %v760_v18, %v682_v12 }
  0xb9   : > { %v694_v21 = vpop.permute.xlu1 %693 }
  0xba   : > { %v692_v13 = vpop.permute.xlu0 %691  ;;  %v778_v61 = vsel %vm774_vm7, %v769_v41, %v694_v21 }
  0xbb   : > { %v776_v44 = vsel %vm774_vm7, %v767_v37, %v692_v13  ;;  %v787_v30 = vsel %vm783_vm8, %v778_v61, %v706_v2  ;;  %v3026_v2 = vld [vmem:[%s3611_s2] ss:$0 sm:$0xff]  ;;  %v1164_v61 = vld [vmem:[#allocation3 + $0x18] sm:$0xf]  ;;  %v3054_v14 = vld [vmem:[#allocation3 + $0x48] sm:$0xf] }
  0xbc   : > { %v785_v54 = vsel %vm783_vm8, %v776_v44, %v704_v8  ;;  %v1200_v8 = vld [vmem:[#allocation3] sm:$0xf] }
  0xbd   : > { %v718_v22 = vpop.permute.xlu1 %717  ;;  %v1220_v37 = vshrl.u32 %v1200_v8, 16 }
  0xbe   : > { %v716_v23 = vpop.permute.xlu0 %715  ;;  %v796_v31 = vsel %vm792_vm9, %v787_v30, %v718_v22 }
  0xbf   : > { %v794_v25 = vsel %vm792_vm9, %v785_v54, %v716_v23  ;;  %v1223_v23 = vshll.u32 %v1200_v8, 16 }
  0xc1   : > { %v648_v26 = vpop.permute.xlu1 %647 }
  0xc2   : > { %v728_v27 = vpop.permute.xlu0 %727  ;;  %v743_v29 = vsel %vm278_vm0, %v605_v33, %v648_v26 }
  0xc3   : > { %v803_v28 = vsel %vm801_vm10, %v794_v25, %v728_v27  ;;  %v1167_v25 = vld [vmem:[#allocation3 + $0x1c] sm:$0x1] }
  0xc4   : > { %2396 = vmatprep.mubr.msk.bf16.mxu0 %vm837_vm11, %v803_v28 }
  0xc5   : > { %v650_v34 = vpop.permute.xlu1 %649 }
  0xc6   : > { %v730_v35 = vpop.permute.xlu0 %729  ;;  %v746_v32 = vsel %vm278_vm0, %v606_v50, %v650_v34  ;;  %v1149_v34 = vld [vmem:[#allocation3 + $0x8] sm:$0xf] }
  0xc7   : > { %v805_v38 = vsel %vm801_vm10, %v796_v31, %v730_v35 }
  0xc8   : > { %2397 = vmatmul.mubr.msk.bf16.vlgmr.msra.gmra.mrb[0].mxu0 %vm837_vm11, %v805_v38  ;;  %v1222_v38 = vrot.slane %v1220_v37, 4 }
  0xc9   : > { %v662_v40 = vpop.permute.xlu1 %661 }
  0xca   : > { %v660_v43 = vpop.permute.xlu0 %659  ;;  %v755_v60 = vsel %vm747_vm4, %v746_v32, %v662_v40 }
  0xcb   : > { %v753_v62 = vsel %vm747_vm4, %v743_v29, %v660_v43  ;;  %v1170_v29 = vld [vmem:[#allocation3 + $0x20] sm:$0xf] }
  0xcd   : > { %v674_v47 = vpop.permute.xlu1 %673 }
  0xce   : > { %v672_v52 = vpop.permute.xlu0 %671  ;;  %v764_v63 = vsel %vm756_vm5, %v755_v60, %v674_v47 }
  0xcf   : > { %v762_v1 = vsel %vm756_vm5, %v753_v62, %v672_v52  ;;  %v1155_v52 = vld [vmem:[#allocation3 + $0xc] sm:$0x1]  ;;  %v1173_v62 = vld [vmem:[#allocation3 + $0x24] sm:$0x1]  ;;  %vm1355_vm5 = vcmask 1042432  }
  0xd1   : > { %v686_v53 = vpop.permute.xlu1 %685 }
  0xd2   : > { %v684_v55 = vpop.permute.xlu0 %683  ;;  %v773_v4 = vsel %vm765_vm6, %v764_v63, %v686_v53 }
  0xd3   : > { %v771_v42 = vsel %vm765_vm6, %v762_v1, %v684_v55  ;;  %v1225_v55 = vrot.slane %v1223_v23, 5 }
  0xd5   : > { %v698_v56 = vpop.permute.xlu1 %697 }
  0xd6   : > { %v696_v57 = vpop.permute.xlu0 %695  ;;  %v782_v24 = vsel %vm774_vm7, %v773_v4, %v698_v56 }
  0xd7   : > { %v780_v33 = vsel %vm774_vm7, %v771_v42, %v696_v57  ;;  %vm1356_vm7 = vcmask 1046532  }
  0xd8   : > { %vm3061_vm12 = vmor %vm1355_vm5, %vm1356_vm7 }
  0xd9   : > { %v710_v58 = vpop.permute.xlu1 %709 }
  0xda   : > { %v708_v59 = vpop.permute.xlu0 %707  ;;  %v791_v45 = vsel %vm783_vm8, %v782_v24, %v710_v58  ;;  %v1158_v24 = vld [vmem:[#allocation3 + $0x10] sm:$0xf] }
  0xdb   : > { %v789_v46 = vsel %vm783_vm8, %v780_v33, %v708_v59  ;;  %v1161_v33 = vld [vmem:[#allocation3 + $0x14] sm:$0x1] }
  0xdd   : > { %v722_v3 = vpop.permute.xlu1 %721 }
  0xde   : > { %v720_v0 = vpop.permute.xlu0 %719  ;;  %v800_v50 = vsel %vm792_vm9, %v791_v45, %v722_v3 }
  0xdf   : > { %v798_v5 = vsel %vm792_vm9, %v789_v46, %v720_v0  ;;  %vm1216_vm9 = vsmask.f32 3328 }
  0xe1   : > { %v734_v6 = vpop.permute.xlu1 %733 }
  0xe2   : > { %v732_v7 = vpop.permute.xlu0 %731  ;;  %v809_v11 = vsel %vm801_vm10, %v800_v50, %v734_v6  ;;  %v1208_v6 = vld [vmem:[#allocation3 + $0x4] sm:$0x1] }
  0xe3   : > { %v807_v12 = vsel %vm801_vm10, %v798_v5, %v732_v7  ;;  %v1331_v7 = vld [vmem:[#allocation3] sm:$0xe]  ;;  %v1360_v8 = vrot.slane %v1208_v6, 5 }
  0xe4   : > { %2400 = vmatprep.mubr.msk.bf16.mxu0 %vm837_vm11, %v807_v12 }
  0xe5   : > { %2401 = vmatmul.mubr.msk.bf16.gmra.mrb[4].mxu0 %vm837_vm11, %v809_v11  ;;  %vm1217_vm11 = vsmask.f32 7440 }
  0xe6   : > { %vm3067_vm13 = vmor %vm1216_vm9, %vm1217_vm11 }
 0x19b   : > { %v2398_v15 = vpop.f32.mrb[0].mxu0 }
 0x19c   : > { %v893_v16 = vadd.f32 %v2398_v15, %v3026_v2  ;;  %v884_v48 = vpop.f32.mrb[1].mxu0 }
 0x19d   : > { %v885_v36 = vadd.f32 %v3026_v2, %v884_v48  ;;  %v2399_v9 = vpop.f32.mrb[2].mxu0  ;;  %v1226_v48 = vor.u32 %v1225_v55, %v1222_v38 }
 0x19e   : > { %v917_v10 = vmax.f32 %v893_v16, 0.0  ;;  %v896_v17 = vadd.f32 %v2399_v9, %v3026_v2  ;;  %v887_v19 = vpop.f32.mrb[3].mxu0  ;;  %v2284_v9 = vrot.slane %v1331_v7, 9 }
 0x19f   : > { %v915_v20 = vmax.f32 %v885_v36, 0.0  ;;  %v888_v21 = vadd.f32 %v3026_v2, %v887_v19  ;;  %v1229_v36 = vshll.u32 %v1208_v6, 16  ;;  %v1693_v19 = vshll.u32 %v3054_v14, 16 }
 0x1a0   : > { %v2362_v13 = vpack.c.bf16 %v917_v10, %v917_v10  ;;  %v918_v18 = vmax.f32 %v896_v17, 0.0  ;;  %v1690_v17 = vshrl.u32 %v3054_v14, 16 }
 0x1a1   : > { %v2360_v44 = vpack.c.bf16 %v915_v20, %v915_v20  ;;  %v916_v22 = vmax.f32 %v888_v21, 0.0  ;;  %v3071_v21 = vrot.slane %v1226_v48, 4  ;;  %v2505_v20 = vld [vmem:[%s3612_s3 + $0x18] sm:$0xff]  }
 0x1a2   : > { %v1082_v41 = vshrl.u32 %v2362_v13, 16  ;;  %v2363_v54 = vpack.c.bf16 %v918_v18, %v918_v18  ;;  %v1085_v30 = vshll.u32 %v2362_v13, 16  ;;  %v3073_v13 = vrot.slane %v1229_v36, 5 }
 0x1a3   : > { %v1066_v26 = vshrl.u32 %v2360_v44, 16  ;;  %v2361_v27 = vpack.c.bf16 %v916_v22, %v916_v22  ;;  %v1069_v47 = vshll.u32 %v2360_v44, 16  ;;  %v3079_v22 = vsel %vm3061_vm12, %v2284_v9, %v1360_v8 }
 0x1a4   : > { %v1084_v28 = vrot.slane %v1082_v41, 7  ;;  %v1090_v35 = vshrl.u32 %v2363_v54, 16  ;;  %v1093_v59 = vshll.u32 %v2363_v54, 16 }
 0x1a5   : > { %v1068_v43 = vrot.slane %v1066_v26, 7  ;;  %v1074_v53 = vshrl.u32 %v2361_v27, 16  ;;  %v1077_v1 = vshll.u32 %v2361_v27, 16 }
 0x1a6   : > { %v1087_v56 = vor.u32 %v1085_v30, %v1084_v28  ;;  %v1088_v57 = vrot.slane %v1084_v28, 4  ;;  %v1092_v58 = vrot.slane %v1090_v35, 7 }
 0x1a7   : > { %v1071_v32 = vor.u32 %v1069_v47, %v1068_v43  ;;  %v1072_v60 = vrot.slane %v1068_v43, 4  ;;  %v1076_v63 = vrot.slane %v1074_v53, 7 }
 0x1a8   : > { %v1165_v3 = vsel %vm3033_vm1, %v1087_v56, %v1164_v61  ;;  %v1168_v0 = vsel %vm3038_vm2, %v1088_v57, %v1167_v25  ;;  %v1095_v4 = vor.u32 %v1093_v59, %v1092_v58  ;;  %v1096_v42 = vrot.slane %v1092_v58, 4 }
 0x1a9   : > { %1166 = vst [vmem:[#allocation3 + $0x18] sm:$0xf] %v1165_v3  ;;  %1169 = vst [vmem:[#allocation3 + $0x1c] sm:$0x1] %v1168_v0  ;;  %v1150_v45 = vsel %vm3033_vm1, %v1071_v32, %v1149_v34  ;;  %v1156_v46 = vsel %vm3038_vm2, %v1072_v60, %v1155_v52  ;;  %v1079_v50 = vor.u32 %v1077_v1, %v1076_v63  ;;  %v1080_v5 = vrot.slane %v1076_v63, 4 }
 0x1aa   : > { %1151 = vst [vmem:[#allocation3 + $0x8] sm:$0xf] %v1150_v45  ;;  %1157 = vst [vmem:[#allocation3 + $0xc] sm:$0x1] %v1156_v46  ;;  %v1171_v11 = vsel %vm3033_vm1, %v1095_v4, %v1170_v29  ;;  %v1174_v12 = vsel %vm3038_vm2, %v1096_v42, %v1173_v62  ;;  %v3081_v61 = vrot.slane %v1690_v17, 4  ;;  %v3083_v25 = vrot.slane %v1693_v19, 5 }
 0x1ab   : > { %1172 = vst [vmem:[#allocation3 + $0x20] sm:$0xf] %v1171_v11  ;;  %1175 = vst [vmem:[#allocation3 + $0x24] sm:$0x1] %v1174_v12  ;;  %v1159_v15 = vsel %vm3033_vm1, %v1079_v50, %v1158_v24  ;;  %v1162_v16 = vsel %vm3038_vm2, %v1080_v5, %v1161_v33 }
 0x1ac   : > { %1160 = vst [vmem:[#allocation3 + $0x10] sm:$0xf] %v1159_v15  ;;  %1163 = vst [vmem:[#allocation3 + $0x14] sm:$0x1] %v1162_v16 }
 0x1b0   : > { %v1392_v18 = vld [vmem:[#allocation3 + $0x18] sm:$0xf]  ;;  %v3075_v37 = vld [vmem:[#allocation3 + $0x1c] sm:$0x1] }
 0x1b1   : > { %v1520_v44 = vld [vmem:[#allocation3 + $0x18] sm:$0xe]  ;;  %v1435_v23 = vshrl.u32 %v1392_v18, 16  ;;  %v1438_v41 = vshll.u32 %v1392_v18, 16  ;;  %v1390_v54 = vld [vmem:[#allocation3 + $0x8] sm:$0xf] }
 0x1b2   : > { %v1393_v26 = vld [vmem:[#allocation3 + $0x20] sm:$0xf]  ;;  %v1407_v27 = vshrl.u32 %v1390_v54, 16  ;;  %v1410_v28 = vshll.u32 %v1390_v54, 16  ;;  %v2294_v30 = vrot.slane %v1520_v44, 9  ;;  %v1552_v34 = vrot.slane %v3075_v37, 5 }
 0x1b3   : > { %v3086_v35 = vrot.slane %v1435_v23, 4  ;;  %v2321_v38 = vcombine.low %v1392_v18, %v1393_v26  ;;  %v1449_v43 = vshrl.u32 %v1393_v26, 16  ;;  %v1391_v47 = vld [vmem:[#allocation3 + $0x10] sm:$0xf]  ;;  %v3088_v52 = vld [vmem:[#allocation3 + $0x24] sm:$0x1] }
 0x1b4   : > { %v1452_v55 = vshll.u32 %v1393_v26, 16  ;;  %v1421_v56 = vshrl.u32 %v1391_v47, 16  ;;  %v1424_v57 = vshll.u32 %v1391_v47, 16  ;;  %v2320_v58 = vcombine.low %v1390_v54, %v1391_v47  ;;  %v1521_v59 = vld [vmem:[#allocation3 + $0x20] sm:$0xe] }
 0x1b5   : > { %v3094_v29 = vrot.slane %v1438_v41, 5  ;;  %1841 = vrot.lane.b32.xlu1 %v2321_v38, %s2578_s21  ;;  %v3097_v32 = vrot.slane %v1449_v43, 4  ;;  %v3099_v60 = vrot.slane %v1407_v27, 4  ;;  %v3101_v62 = vrot.slane %v1410_v28, 5  ;;  %v1575_v63 = vld [vmem:[#allocation3 + $0x10] sm:$0xf] }
 0x1b6   : > { %v3103_v1 = vrot.slane %v1452_v55, 5  ;;  %v3105_v3 = vrot.slane %v1421_v56, 4  ;;  %v3107_v0 = vrot.slane %v1424_v57, 5  ;;  %1839 = vrot.lane.b32.xlu0 %v2320_v58, %s2578_s21  ;;  %v2295_v4 = vrot.slane %v1521_v59, 9  ;;  %v3110_v42 = vld [vmem:[#allocation3 + $0x18] sm:$0xf] }
 0x1b7   : > { %v1556_v24 = vrot.slane %v3088_v52, 5  ;;  %v1592_v33 = vshrl.u32 %v1575_v63, 16  ;;  %v1595_v45 = vshll.u32 %v1575_v63, 16  ;;  %v1606_v46 = vshrl.u32 %v3110_v42, 16  ;;  %v3118_v11 = vld [vmem:[#allocation3 + $0x14] sm:$0x1] }
 0x1b8   : > { %v2402_v50 = vpop.f32.mrb[4].mxu0  ;;  %v1553_v5 = vsel %vm3061_vm12, %v2294_v30, %v1552_v34  ;;  %v1609_v6 = vshll.u32 %v3110_v42, 16  ;;  %v2332_v7 = vcombine.low %v1575_v63, %v3110_v42  ;;  %v1333_v12 = vld [vmem:[#allocation3 + $0x10] sm:$0xe]  ;;  %v1413_v15 = vor.u32 %v3101_v62, %v3099_v60  ;;  %v3127_v8 = vld [vmem:[#allocation3 + $0x1c] sm:$0x1] }
 0x1b9   : > { %v909_v16 = vadd.f32 %v2402_v50, %v3026_v2  ;;  %v1557_v48 = vsel %vm3061_vm12, %v2295_v4, %v1556_v24  ;;  %v900_v36 = vpop.f32.mrb[5].mxu0  ;;  %v3125_v9 = vrot.slane %v1592_v33, 4  ;;  %v1334_v17 = vld [vmem:[#allocation3 + $0x18] sm:$0xe]  ;;  %v3132_v23 = vrot.slane %v1595_v45, 5 }
 0x1ba   : > { %v2329_v18 = vcombine.low %v1553_v5, %v1557_v48  ;;  %v901_v44 = vadd.f32 %v3026_v2, %v900_v36  ;;  %v3134_v41 = vrot.slane %v1606_v46, 4  ;;  %1907 = vrot.lane.b32.xlu0 %v2332_v7, %s2584_s23  ;;  %v2403_v54 = vpop.f32.mrb[6].mxu0  ;;  %v3137_v26 = vld [vmem:[#allocation3 + $0xc] sm:$0x1]  ;;  %v2286_v34 = vrot.slane %v1333_v12, 9 }
 0x1bb   : > { %v921_v27 = vmax.f32 %v909_v16, 0.0  ;;  %v912_v28 = vadd.f32 %v2403_v54, %v3026_v2  ;;  %v903_v30 = vpop.f32.mrb[7].mxu0  ;;  %v1368_v38 = vrot.slane %v3118_v11, 5  ;;  %v1332_v43 = vld [vmem:[#allocation3 + $0x8] sm:$0xe]  ;;  %v2287_v56 = vrot.slane %v1334_v17, 9 }
 0x1bc   : > { %1881 = vrot.lane.b32.xlu1 %v2329_v18, %s2585_s29  ;;  %v919_v47 = vmax.f32 %v901_v44, 0.0  ;;  %v904_v55 = vadd.f32 %v3026_v2, %v903_v30  ;;  %v1372_v57 = vrot.slane %v3127_v8, 5  ;;  %v2285_v4 = vrot.slane %v1332_v43, 9  ;;  %v1518_v12 = vld [vmem:[#allocation3 + $0x8] sm:$0xe] }
 0x1bd   : > { %v2366_v58 = vpack.c.bf16 %v921_v27, %v921_v27  ;;  %v922_v59 = vmax.f32 %v912_v28, 0.0  ;;  %v1369_v63 = vsel %vm3061_vm12, %v2286_v34, %v1368_v38  ;;  %v1364_v46 = vrot.slane %v3137_v26, 5  ;;  %v1188_v16 = vld [vmem:[#allocation3 + $0x38] sm:$0xf]  ;;  %v1191_v48 = vld [vmem:[#allocation3 + $0x3c] sm:$0x1] }
 0x1be   : > { %v2364_v24 = vpack.c.bf16 %v919_v47, %v919_v47  ;;  %v920_v33 = vmax.f32 %v904_v55, 0.0  ;;  %v1373_v45 = vsel %vm3061_vm12, %v2287_v56, %v1372_v57  ;;  %v3151_v54 = vld [vmem:[#allocation3 + $0xc] sm:$0x1]  ;;  %v1176_v28 = vld [vmem:[#allocation3 + $0x28] sm:$0xf]  ;;  %v1441_v42 = vor.u32 %v3094_v29, %v3086_v35 }
 0x1bf   : > { %v1114_v50 = vshrl.u32 %v2366_v58, 16  ;;  %v1117_v5 = vshll.u32 %v2366_v58, 16  ;;  %v2367_v7 = vpack.c.bf16 %v922_v59, %v922_v59  ;;  %v2317_v2 = vcombine.low %v1369_v63, %v1373_v45  ;;  %v1179_v30 = vld [vmem:[#allocation3 + $0x2c] sm:$0x1]  ;;  %v1519_v47 = vld [vmem:[#allocation3 + $0x10] sm:$0xe] }
 0x1c0   : > { %v1098_v36 = vshrl.u32 %v2364_v24, 16  ;;  %v1101_v17 = vshll.u32 %v2364_v24, 16  ;;  %v2365_v18 = vpack.c.bf16 %v920_v33, %v920_v33  ;;  %v1365_v44 = vsel %vm3061_vm12, %v2285_v4, %v1364_v46  ;;  %v1194_v56 = vld [vmem:[#allocation3 + $0x40] sm:$0xf]  ;;  %v1197_v57 = vld [vmem:[#allocation3 + $0x44] sm:$0x1] }
 0x1c1   : > { %v1116_v27 = vrot.slane %v1114_v50, 7  ;;  %v1122_v34 = vshrl.u32 %v2367_v7, 16  ;;  %v1125_v38 = vshll.u32 %v2367_v7, 16  ;;  %1813 = vrot.lane.b32.xlu1 %v2317_v2, %s2577_s20  ;;  %v2316_v43 = vcombine.low %v3079_v22, %v1365_v44  ;;  %v1182_v45 = vld [vmem:[#allocation3 + $0x30] sm:$0xf] }
 0x1c2   : > { %v1100_v55 = vrot.slane %v1098_v36, 7  ;;  %v1106_v58 = vshrl.u32 %v2365_v18, 16  ;;  %v1109_v59 = vshll.u32 %v2365_v18, 16  ;;  %v2292_v63 = vrot.slane %v1518_v12, 9  ;;  %v1185_v46 = vld [vmem:[#allocation3 + $0x34] sm:$0x1] }
 0x1c3   : > { %v1119_v24 = vor.u32 %v1117_v5, %v1116_v27  ;;  %v1120_v4 = vrot.slane %v1116_v27, 4  ;;  %v1124_v33 = vrot.slane %v1122_v34, 7  ;;  %1811 = vrot.lane.b32.xlu0 %v2316_v43, %s2577_s20  ;;  %v3156_v50 = vld [vmem:[#allocation3 + $0x14] sm:$0x1]  ;;  %v1544_v7 = vrot.slane %v3151_v54, 5 }
 0x1c4   : > { %v1103_v2 = vor.u32 %v1101_v17, %v1100_v55  ;;  %v1104_v22 = vrot.slane %v1100_v55, 4  ;;  %v1108_v44 = vrot.slane %v1106_v58, 7  ;;  %v2293_v36 = vrot.slane %v1519_v47, 9  ;;  %v3159_v19 = vld [vmem:[#allocation3 + $0x14] sm:$0x1] }
 0x1c5   : > { %v1189_v12 = vsel %vm3033_vm1, %v1119_v24, %v1188_v16  ;;  %v1192_v5 = vsel %vm3038_vm2, %v1120_v4, %v1191_v48  ;;  %v1127_v18 = vor.u32 %v1125_v38, %v1124_v33  ;;  %v1128_v27 = vrot.slane %v1124_v33, 4  ;;  %v3165_v34 = vld [vmem:[#allocation3 + $0x1c] sm:$0x1]  ;;  %v1703_v43 = vld [vmem:[#allocation3 + $0x10] sm:$0xe] }
 0x1c6   : > { %1190 = vst [vmem:[#allocation3 + $0x38] sm:$0xf] %v1189_v12  ;;  %1193 = vst [vmem:[#allocation3 + $0x3c] sm:$0x1] %v1192_v5  ;;  %v1177_v17 = vsel %vm3033_vm1, %v1103_v2, %v1176_v28  ;;  %v1180_v47 = vsel %vm3038_vm2, %v1104_v22, %v1179_v30  ;;  %v1111_v55 = vor.u32 %v1109_v59, %v1108_v44  ;;  %v1112_v58 = vrot.slane %v1108_v44, 4 }
 0x1c7   : > { %v1704_v53 = vld [vmem:[#allocation3 + $0x18] sm:$0xe]  ;;  %v3171_v16 = vld [vmem:[#allocation3 + $0x8] sm:$0xf]  ;;  %1178 = vst [vmem:[#allocation3 + $0x28] sm:$0xf] %v1177_v17  ;;  %v1195_v48 = vsel %vm3033_vm1, %v1127_v18, %v1194_v56  ;;  %v1198_v38 = vsel %vm3038_vm2, %v1128_v27, %v1197_v57  ;;  %v1545_v24 = vsel %vm3061_vm12, %v2292_v63, %v1544_v7  ;;  %v1598_v29 = vor.u32 %v3132_v23, %v3125_v9 }
 0x1c8   : > { %1181 = vst [vmem:[#allocation3 + $0x2c] sm:$0x1] %v1180_v47  ;;  %v1548_v28 = vrot.slane %v3156_v50, 5  ;;  %1196 = vst [vmem:[#allocation3 + $0x40] sm:$0xf] %v1195_v48  ;;  %v1183_v30 = vsel %vm3033_vm1, %v1111_v55, %v1182_v45  ;;  %v1186_v59 = vsel %vm3038_vm2, %v1112_v58, %v1185_v46  ;;  %v2300_v4 = vrot.slane %v1703_v43, 9 }
 0x1c9   : > { %1199 = vst [vmem:[#allocation3 + $0x44] sm:$0x1] %v1198_v38  ;;  %v1729_v33 = vrot.slane %v3159_v19, 5  ;;  %v1577_v56 = vld [vmem:[#allocation3 + $0x20] sm:$0xf]  ;;  %v2301_v63 = vrot.slane %v1704_v53, 9  ;;  %v3627_v9 = vsel %vm3067_vm13, %v3071_v21, %v3073_v13 }
 0x1ca   : > { %1184 = vst [vmem:[#allocation3 + $0x30] sm:$0xf] %v1183_v30  ;;  %1187 = vst [vmem:[#allocation3 + $0x34] sm:$0x1] %v1186_v59  ;;  %v1549_v57 = vsel %vm3061_vm12, %v2293_v36, %v1548_v28  ;;  %v1733_v7 = vrot.slane %v3165_v34, 5  ;;  %v1234_v2 = vshrl.u32 %v3171_v16, 16  ;;  %v1455_v28 = vor.u32 %v3103_v1, %v3097_v32 }
 0x1cb   : > { %v2328_v22 = vcombine.low %v1545_v24, %v1549_v57  ;;  %v1730_v31 = vsel %vm3061_vm12, %v2300_v4, %v1729_v33  ;;  %v1237_v40 = vshll.u32 %v3171_v16, 16  ;;  %v1243_v45 = vshll.u32 %v3137_v26, 16  ;;  %v3198_v53 = vld [vmem:[%s3614_s5] sm:$0x3] }
 0x1cc   : > { %v1734_v46 = vsel %vm3061_vm12, %v2301_v63, %v1733_v7  ;;  %v1236_v44 = vrot.slane %v1234_v2, 4  ;;  %v1620_v12 = vshrl.u32 %v1577_v56, 16  ;;  %v1623_v5 = vshll.u32 %v1577_v56, 16  ;;  %2433 = vmatprep.subr.msk.bf16.mxu1 %vm846_vm3, %v3198_v53 }
 0x1cd   : > { %v3202_v36 = vrot.slane %v1609_v6, 5  ;;  %1879 = vrot.lane.b32.xlu0 %v2328_v22, %s2585_s29  ;;  %v2340_v18 = vcombine.low %v1730_v31, %v1734_v46  ;;  %v1239_v27 = vrot.slane %v1237_v40, 5  ;;  %v1245_v26 = vrot.slane %v1243_v45, 5  ;;  %v1396_v47 = vld [vmem:[#allocation3 + $0x38] sm:$0xf] }
 0x1ce   : > { %v3207_v43 = vrot.slane %v1620_v12, 4  ;;  %v3209_v17 = vrot.slane %v1623_v5, 5  ;;  %v3214_v55 = vrot.slane %v1413_v15, 4  ;;  %v1578_v58 = vld [vmem:[#allocation3 + $0x28] sm:$0xf]  ;;  %v1491_v38 = vshrl.u32 %v1396_v47, 16 }
 0x1cf   : > { %v1240_v6 = vor.u32 %v1239_v27, %v1236_v44  ;;  %v1394_v48 = vld [vmem:[#allocation3 + $0x28] sm:$0xf]  ;;  %v1494_v24 = vshll.u32 %v1396_v47, 16  ;;  %v2333_v30 = vcombine.low %v1577_v56, %v1578_v58  ;;  %v1634_v59 = vshrl.u32 %v1578_v58, 16  ;;  %v1397_v57 = vld [vmem:[#allocation3 + $0x40] sm:$0xf] }
 0x1d0   : > { %v1637_v4 = vshll.u32 %v1578_v58, 16  ;;  %v1463_v33 = vshrl.u32 %v1394_v48, 16  ;;  %v1466_v15 = vshll.u32 %v1394_v48, 16  ;;  %v3221_v35 = vrot.slane %v1491_v38, 4  ;;  %v1580_v45 = vld [vmem:[#allocation3 + $0x38] sm:$0xf] }
 0x1d1   : > { %1947 = vrot.lane.b32.xlu0 %v2340_v18, %s2586_s13  ;;  %v1241_v60 = vrot.slane %v1240_v6, 4  ;;  %v1395_v62 = vld [vmem:[#allocation3 + $0x30] sm:$0xf]  ;;  %1909 = vrot.lane.b32.xlu1 %v2333_v30, %s2584_s23  ;;  %v3226_v63 = vrot.slane %v1634_v59, 4  ;;  %v3228_v56 = vrot.slane %v1494_v24, 5  ;;  %v1505_v12 = vshrl.u32 %v1397_v57, 16 }
 0x1d2   : > { %v1477_v32 = vshrl.u32 %v1395_v62, 16  ;;  %v1480_v1 = vshll.u32 %v1395_v62, 16  ;;  %v1579_v7 = vld [vmem:[#allocation3 + $0x30] sm:$0xf]  ;;  %v3232_v22 = vrot.slane %v1637_v4, 5  ;;  %v2322_v31 = vcombine.low %v1394_v48, %v1395_v62 }
 0x1d3   : > { %v1246_v2 = vsel %vm3067_vm13, %v1241_v60, %v1245_v26  ;;  %v3234_v40 = vrot.slane %v1463_v33, 4  ;;  %v3243_v44 = vrot.slane %v1466_v15, 5  ;;  %v3245_v5 = vld [vmem:[#allocation3 + $0x40] sm:$0xf]  ;;  %v1508_v18 = vshll.u32 %v1397_v57, 16 }
 0x1d4   : > { %v2312_v23 = vcombine.low %v3627_v9, %v1246_v2  ;;  %v3241_v46 = vrot.slane %v1477_v32, 4  ;;  %v2323_v27 = vcombine.low %v1396_v47, %v1397_v57  ;;  %v1648_v26 = vshrl.u32 %v1579_v7, 16 }
 0x1d5   : > { %v1651_v6 = vshll.u32 %v1579_v7, 16  ;;  %v3248_v58 = vrot.slane %v1480_v1, 5  ;;  %v3250_v48 = vrot.slane %v1505_v12, 4  ;;  %v1662_v38 = vshrl.u32 %v1580_v45, 16 }
 0x1d6   : > { %1791 = vrot.lane.b32.xlu0 %v2312_v23, %s2579_s22  ;;  %v1665_v21 = vshll.u32 %v1580_v45, 16  ;;  %v3252_v13 = vrot.slane %v1508_v18, 5  ;;  %1845 = vrot.lane.b32.xlu1 %v2323_v27, %s2578_s21  ;;  %v3255_v24 = vrot.slane %v1648_v26, 4  ;;  %v2334_v30 = vcombine.low %v1579_v7, %v1580_v45  ;;  %v3276_v23 = vld [vmem:[#allocation3 + $0x10] sm:$0xf] }
 0x1d7   : > { %v1676_v59 = vshrl.u32 %v3245_v5, 16  ;;  %v3258_v47 = vrot.slane %v1651_v6, 5  ;;  %v3260_v4 = vrot.slane %v1662_v38, 4  ;;  %v1679_v57 = vshll.u32 %v3245_v5, 16  ;;  %v3289_v18 = vld [vmem:[#allocation3 + $0x18] sm:$0xf] }
 0x1d8   : > { %v3262_v33 = vrot.slane %v1665_v21, 5  ;;  %v2335_v60 = vcombine.low %v3245_v5, %v3054_v14  ;;  %v1416_v62 = vshll.u32 %v3151_v54, 16  ;;  %v3628_v15 = vor.u32 %v3107_v0, %v3105_v3  ;;  %v1705_v27 = vld [vmem:[#allocation3 + $0x20] sm:$0xe]  ;;  %v3300_v21 = vld [vmem:[#allocation3 + $0x2c] sm:$0x1] }
 0x1d9   : > { %v1430_v1 = vshll.u32 %v3156_v50, 16  ;;  %v3273_v7 = vrot.slane %v1676_v59, 4  ;;  %v1442_v2 = vrot.slane %v1441_v42, 4  ;;  %v1444_v45 = vshll.u32 %v3075_v37, 16 }
 0x1da   : > { %v1428_v32 = vrot.slane %v3628_v15, 4  ;;  %1843 = vrot.lane.b32.xlu0 %v2322_v31, %s2578_s21  ;;  %v1456_v9 = vrot.slane %v1455_v28, 4  ;;  %1913 = vrot.lane.b32.xlu1 %v2335_v60, %s2584_s23  ;;  %v1418_v14 = vrot.slane %v1416_v62, 5  ;;  %v1458_v12 = vshll.u32 %v3088_v52, 16  ;;  %v1706_v15 = vld [vmem:[#allocation3 + $0x28] sm:$0xe] }
 0x1db   : > { %v1432_v54 = vrot.slane %v1430_v1, 5  ;;  %v1599_v3 = vrot.slane %v1598_v29, 4  ;;  %v1446_v0 = vrot.slane %v1444_v45, 5  ;;  %v1601_v50 = vshll.u32 %v3159_v19, 16  ;;  %v3295_v29 = vld [vmem:[#allocation3 + $0x24] sm:$0x1] }
 0x1dc   : > { %v1612_v31 = vor.u32 %v3202_v36, %v3134_v41  ;;  %v1615_v42 = vshll.u32 %v3165_v34, 16  ;;  %v1419_v37 = vsel %vm3067_vm13, %v3214_v55, %v1418_v14  ;;  %v1460_v5 = vrot.slane %v1458_v12, 5  ;;  %v3312_v14 = vld [vmem:[#allocation3 + $0x44] sm:$0x1]  ;;  %v1335_v12 = vld [vmem:[#allocation3 + $0x20] sm:$0xe] }
 0x1dd   : > { %v1433_v28 = vsel %vm3067_vm13, %v1428_v32, %v1432_v54  ;;  %v1248_v52 = vshrl.u32 %v3276_v23, 16  ;;  %v1447_v41 = vsel %vm3067_vm13, %v1442_v2, %v1446_v0  ;;  %v1603_v36 = vrot.slane %v1601_v50, 5  ;;  %v3306_v32 = vld [vmem:[#allocation3 + $0x3c] sm:$0x1]  ;;  %v1524_v54 = vld [vmem:[#allocation3 + $0x38] sm:$0xe] }
 0x1de   : > { %1911 = vrot.lane.b32.xlu0 %v2334_v30, %s2584_s23  ;;  %v2324_v19 = vcombine.low %v1419_v37, %v1433_v28  ;;  %v1613_v34 = vrot.slane %v1612_v31, 4  ;;  %v1461_v55 = vsel %vm3067_vm13, %v1456_v9, %v1460_v5  ;;  %v1617_v26 = vrot.slane %v1615_v42, 5  ;;  %v1525_v31 = vld [vmem:[#allocation3 + $0x40] sm:$0xe]  ;;  %v3318_v42 = vld [vmem:[#allocation3 + $0x24] sm:$0x1] }
 0x1df   : > { %v1250_v6 = vrot.slane %v1248_v52, 4  ;;  %v1251_v38 = vshll.u32 %v3276_v23, 16  ;;  %v2325_v59 = vcombine.low %v1447_v41, %v1461_v55  ;;  %v1604_v30 = vsel %vm3067_vm13, %v1599_v3, %v1603_v36  ;;  %v3321_v52 = vld [vmem:[#allocation3 + $0x2c] sm:$0x1]  ;;  %s2587_s21 = smov 56  }
 0x1e0   : > { %v1257_v60 = vshll.u32 %v3118_v11, 16  ;;  %v1262_v62 = vshrl.u32 %v3289_v18, 16  ;;  %v1618_v1 = vsel %vm3067_vm13, %v1613_v34, %v1617_v26  ;;  %v1265_v45 = vshll.u32 %v3289_v18, 16  ;;  %v1336_v34 = vld [vmem:[#allocation3 + $0x28] sm:$0xe] }
 0x1e1   : > { %v1253_v2 = vrot.slane %v1251_v38, 5  ;;  %v1271_v9 = vshll.u32 %v3127_v8, 16  ;;  %v3314_v3 = vrot.slane %v1679_v57, 5  ;;  %1861 = vrot.lane.b32.xlu1 %v2325_v59, %s2582_s17  ;;  %v2336_v11 = vcombine.low %v1604_v30, %v1618_v1  ;;  %v1337_v59 = vld [vmem:[#allocation3 + $0x30] sm:$0xe] }
 0x1e2   : > { %1859 = vrot.lane.b32.xlu0 %v2324_v19, %s2582_s17  ;;  %v1264_v0 = vrot.slane %v1262_v62, 4  ;;  %v2302_v50 = vrot.slane %v1705_v27, 9  ;;  %v1259_v28 = vrot.slane %v1257_v60, 5  ;;  %v1267_v5 = vrot.slane %v1265_v45, 5  ;;  %v3333_v1 = vld [vmem:[#allocation3 + $0x3c] sm:$0x1] }
 0x1e3   : > { %v1254_v37 = vor.u32 %v1253_v2, %v1250_v6  ;;  %v1737_v8 = vrot.slane %v3295_v29, 5  ;;  %v1273_v41 = vrot.slane %v1271_v9, 5  ;;  %v2303_v57 = vrot.slane %v1706_v15, 9  ;;  %v3331_v15 = vld [vmem:[#allocation3 + $0x34] sm:$0x1] }
 0x1e4   : > { %v1741_v36 = vrot.slane %v3300_v21, 5  ;;  %v2298_v19 = vrot.slane %v1524_v54, 9  ;;  %v1268_v26 = vor.u32 %v1267_v5, %v1264_v0  ;;  %v1568_v27 = vrot.slane %v3306_v32, 5  ;;  %v1402_v0 = vld [vmem:[#allocation3 + $0x2c] sm:$0x1] }
 0x1e5   : > { %v1255_v55 = vrot.slane %v1254_v37, 4  ;;  %v2299_v38 = vrot.slane %v1525_v31, 9  ;;  %v1738_v6 = vsel %vm3061_vm12, %v2302_v50, %v1737_v8  ;;  %v1572_v60 = vrot.slane %v3312_v14, 5  ;;  %v1522_v5 = vld [vmem:[#allocation3 + $0x28] sm:$0xe] }
 0x1e6   : > { %1927 = vrot.lane.b32.xlu0 %v2336_v11, %s2587_s21  ;;  %v1742_v30 = vsel %vm3061_vm12, %v2303_v57, %v1741_v36  ;;  %v2288_v62 = vrot.slane %v1335_v12, 9  ;;  %v1269_v45 = vrot.slane %v1268_v26, 4  ;;  %v1376_v54 = vrot.slane %v3318_v42, 5  ;;  %v1338_v11 = vld [vmem:[#allocation3 + $0x38] sm:$0xe] }
 0x1e7   : > { %v1260_v2 = vsel %vm3067_vm13, %v1255_v55, %v1259_v28  ;;  %v2341_v9 = vcombine.low %v1738_v6, %v1742_v30  ;;  %v1573_v50 = vsel %vm3061_vm12, %v2299_v38, %v1572_v60  ;;  %v2289_v31 = vrot.slane %v1336_v34, 9  ;;  %v1403_v55 = vld [vmem:[#allocation3 + $0x34] sm:$0x1]  ;;  %v1523_v26 = vld [vmem:[#allocation3 + $0x30] sm:$0xe] }
 0x1e8   : > { %v1380_v37 = vrot.slane %v3321_v52, 5  ;;  %v2290_v12 = vrot.slane %v1337_v59, 9  ;;  %v1274_v8 = vsel %vm3067_vm13, %v1269_v45, %v1273_v41  ;;  %v1569_v28 = vsel %vm3061_vm12, %v2298_v19, %v1568_v27 }
 0x1e9   : > { %v1377_v57 = vsel %vm3061_vm12, %v2288_v62, %v1376_v54  ;;  %v1384_v36 = vrot.slane %v3331_v15, 5  ;;  %v2313_v6 = vcombine.low %v1260_v2, %v1274_v8  ;;  %v2291_v38 = vrot.slane %v1338_v11, 9 }
 0x1ea   : > { %1949 = vrot.lane.b32.xlu0 %v2341_v9, %s2586_s13  ;;  %v1381_v34 = vsel %vm3061_vm12, %v2289_v31, %v1380_v37  ;;  %v1388_v59 = vrot.slane %v3333_v1, 5  ;;  %v2331_v41 = vcombine.low %v1569_v28, %v1573_v50  ;;  %v2296_v60 = vrot.slane %v1522_v5, 9 }
 0x1eb   : > { %v2318_v30 = vcombine.low %v1377_v57, %v1381_v34  ;;  %v1560_v19 = vrot.slane %v1402_v0, 5  ;;  %1793 = vrot.lane.b32.xlu1 %v2313_v6, %s2579_s22  ;;  %v1385_v27 = vsel %vm3061_vm12, %v2290_v12, %v1384_v36  ;;  %v2297_v62 = vrot.slane %v1523_v26, 9  ;;  %v3377_v6 = vld [vmem:[#allocation3 + $0x28] sm:$0xf] }
 0x1ec   : > { %v1564_v45 = vrot.slane %v1403_v55, 5  ;;  %v1626_v2 = vor.u32 %v3209_v17, %v3207_v43  ;;  %v1389_v9 = vsel %vm3061_vm12, %v2291_v38, %v1388_v59  ;;  %v1629_v11 = vshll.u32 %v3295_v29, 16  ;;  %v3370_v17 = vld [vmem:[#allocation3 + $0x20] sm:$0xf] }
 0x1ed   : > { %v1561_v54 = vsel %vm3061_vm12, %v2296_v60, %v1560_v19  ;;  %v1640_v50 = vor.u32 %v3232_v22, %v3226_v63  ;;  %v1643_v12 = vshll.u32 %v3300_v21, 16  ;;  %v1469_v43 = vor.u32 %v3243_v44, %v3234_v40 }
 0x1ee   : > { %1815 = vrot.lane.b32.xlu0 %v2318_v30, %s2577_s20  ;;  %v1565_v31 = vsel %vm3061_vm12, %v2297_v62, %v1564_v45  ;;  %v1627_v37 = vrot.slane %v1626_v2, 4  ;;  %v1631_v8 = vrot.slane %v1629_v11, 5  ;;  %v1472_v29 = vshll.u32 %v1402_v0, 16  ;;  %v1587_v30 = vld [vmem:[#allocation3 + $0x34] sm:$0x1] }
 0x1ef   : > { %v2330_v5 = vcombine.low %v1561_v54, %v1565_v31  ;;  %v1641_v28 = vrot.slane %v1640_v50, 4  ;;  %1885 = vrot.lane.b32.xlu1 %v2331_v41, %s2585_s29  ;;  %v1645_v63 = vrot.slane %v1643_v12, 5  ;;  %v1470_v22 = vrot.slane %v1469_v43, 4  ;;  %v1588_v45 = vld [vmem:[#allocation3 + $0x3c] sm:$0x1] }
 0x1f0   : > { %v1483_v57 = vor.u32 %v3248_v58, %v3241_v46  ;;  %v1486_v36 = vshll.u32 %v1403_v55, 16  ;;  %v2319_v26 = vcombine.low %v1385_v27, %v1389_v9  ;;  %v1632_v21 = vsel %vm3067_vm13, %v1627_v37, %v1631_v8 }
 0x1f1   : > { %v1276_v40 = vshrl.u32 %v3370_v17, 16  ;;  %v1279_v44 = vshll.u32 %v3370_v17, 16  ;;  %v1646_v0 = vsel %vm3067_vm13, %v1641_v28, %v1645_v63  ;;  %v1474_v34 = vrot.slane %v1472_v29, 5 }
 0x1f2   : > { %1883 = vrot.lane.b32.xlu0 %v2330_v5, %s2585_s29  ;;  %v1484_v38 = vrot.slane %v1483_v57, 4  ;;  %v1488_v59 = vrot.slane %v1486_v36, 5  ;;  %v2337_v46 = vcombine.low %v1632_v21, %v1646_v0  ;;  %v1285_v41 = vshll.u32 %v3318_v42, 16 }
 0x1f3   : > { %v1278_v58 = vrot.slane %v1276_v40, 4  ;;  %v1281_v55 = vrot.slane %v1279_v44, 5  ;;  %1817 = vrot.lane.b32.xlu1 %v2319_v26, %s2577_s20  ;;  %v1475_v60 = vsel %vm3067_vm13, %v1470_v22, %v1474_v34  ;;  %v1290_v27 = vshrl.u32 %v3377_v6, 16  ;;  %v1708_v40 = vld [vmem:[#allocation3 + $0x38] sm:$0xe] }
 0x1f4   : > { %v1489_v19 = vsel %vm3067_vm13, %v1484_v38, %v1488_v59  ;;  %v1293_v62 = vshll.u32 %v3377_v6, 16  ;;  %v1299_v54 = vshll.u32 %v3321_v52, 16  ;;  %v1654_v42 = vor.u32 %v3258_v47, %v3255_v24  ;;  %v1707_v47 = vld [vmem:[#allocation3 + $0x30] sm:$0xe]  ;;  %v3415_v59 = vld [vmem:[#allocation3 + $0x38] sm:$0xf] }
 0x1f5   : > { %v2326_v2 = vcombine.low %v1475_v60, %v1489_v19  ;;  %v1282_v9 = vor.u32 %v1281_v55, %v1278_v58  ;;  %v1292_v11 = vrot.slane %v1290_v27, 4  ;;  %v1657_v31 = vshll.u32 %v1587_v30, 16 }
 0x1f6   : > { %v1295_v50 = vrot.slane %v1293_v62, 5  ;;  %v1668_v37 = vor.u32 %v3262_v33, %v3260_v4  ;;  %v1287_v43 = vrot.slane %v1285_v41, 5  ;;  %v1655_v5 = vrot.slane %v1654_v42, 4 }
 0x1f7   : > { %1863 = vrot.lane.b32.xlu0 %v2326_v2, %s2582_s17  ;;  %v1283_v12 = vrot.slane %v1282_v9, 4  ;;  %v1671_v8 = vshll.u32 %v1588_v45, 16  ;;  %1929 = vrot.lane.b32.xlu1 %v2337_v46, %s2587_s21  ;;  %v1659_v29 = vrot.slane %v1657_v31, 5  ;;  %v1497_v24 = vor.u32 %v3228_v56, %v3221_v35 }
 0x1f8   : > { %v1296_v28 = vor.u32 %v1295_v50, %v1292_v11  ;;  %v1669_v52 = vrot.slane %v1668_v37, 4  ;;  %v1301_v63 = vrot.slane %v1299_v54, 5  ;;  %v1500_v57 = vshll.u32 %v3306_v32, 16  ;;  %v3411_v32 = vld [vmem:[#allocation3 + $0x30] sm:$0xf] }
 0x1f9   : > { %v1673_v22 = vrot.slane %v1671_v8, 5  ;;  %v1511_v4 = vor.u32 %v3252_v13, %v3250_v48  ;;  %v1288_v33 = vsel %vm3067_vm13, %v1283_v12, %v1287_v43  ;;  %v1660_v26 = vsel %vm3067_vm13, %v1655_v5, %v1659_v29  ;;  %v1590_v50 = vld [vmem:[#allocation3 + $0x4c] sm:$0x1]  ;;  %v1589_v12 = vld [vmem:[#allocation3 + $0x44] sm:$0x1] }
 0x1fa   : > { %v1297_v36 = vrot.slane %v1296_v28, 4  ;;  %v1514_v21 = vshll.u32 %v3312_v14, 16  ;;  %v1498_v56 = vrot.slane %v1497_v24, 4  ;;  %v2304_v0 = vrot.slane %v1707_v47, 9 }
 0x1fb   : > { %v1674_v35 = vsel %vm3067_vm13, %v1669_v52, %v1673_v22  ;;  %v1512_v44 = vrot.slane %v1511_v4, 4  ;;  %v1745_v38 = vrot.slane %v1587_v30, 5  ;;  %v1502_v58 = vrot.slane %v1500_v57, 5  ;;  %v2501_v52 = vld [vmem:[%s3612_s3] sm:$0xff]  }
 0x1fc   : > { %v1302_v48 = vsel %vm3067_vm13, %v1297_v36, %v1301_v63  ;;  %v2338_v13 = vcombine.low %v1660_v26, %v1674_v35  ;;  %v1516_v34 = vrot.slane %v1514_v21, 5  ;;  %v2305_v14 = vrot.slane %v1708_v40, 9  ;;  %v2502_v36 = vld [vmem:[%s3612_s3 + $0x8] sm:$0xff]   ;;  %v1709_v26 = vld [vmem:[#allocation3 + $0x40] sm:$0xe] }
 0x1fd   : > { %v2314_v46 = vcombine.low %v1288_v33, %v1302_v48  ;;  %v1749_v55 = vrot.slane %v1588_v45, 5  ;;  %v1746_v60 = vsel %vm3061_vm12, %v2304_v0, %v1745_v38  ;;  %v1304_v19 = vshrl.u32 %v3411_v32, 16  ;;  %v1710_v33 = vld [vmem:[#allocation3 + $0x48] sm:$0xe] }
 0x1fe   : > { %1931 = vrot.lane.b32.xlu0 %v2338_v13, %s2587_s21  ;;  %v1517_v41 = vsel %vm3067_vm13, %v1512_v44, %v1516_v34  ;;  %v1307_v27 = vshll.u32 %v3411_v32, 16  ;;  %v1503_v30 = vsel %vm3067_vm13, %v1498_v56, %v1502_v58  ;;  %v1313_v45 = vshll.u32 %v3331_v15, 16 }
 0x1ff   : > { %1795 = vrot.lane.b32.xlu1 %v2314_v46, %s2579_s22  ;;  %v1750_v62 = vsel %vm3061_vm12, %v2305_v14, %v1749_v55  ;;  %v1318_v2 = vshrl.u32 %v3415_v59, 16  ;;  %v1306_v54 = vrot.slane %v1304_v19, 4  ;;  %v1321_v11 = vshll.u32 %v3415_v59, 16  ;;  %v2504_v46 = vld [vmem:[%s3612_s3 + $0x10] sm:$0xff]  }
 0x200   : > { %v2342_v9 = vcombine.low %v1746_v60, %v1750_v62  ;;  %v1309_v42 = vrot.slane %v1307_v27, 5  ;;  %v2327_v31 = vcombine.low %v1503_v30, %v1517_v41  ;;  %v1696_v43 = vor.u32 %v3083_v25, %v3081_v61  ;;  %v2506_v41 = vld [vmem:[%s3612_s3 + $0x20] ss:$0 sps:$4 sm:$0xff]  }
 0x201   : > { %v1320_v37 = vrot.slane %v1318_v2, 4  ;;  %v1699_v5 = vshll.u32 %v1590_v50, 16  ;;  %v1323_v28 = vrot.slane %v1321_v11, 5  ;;  %v1327_v15 = vshll.u32 %v3333_v1, 16 }
 0x202   : > { %1951 = vrot.lane.b32.xlu0 %v2342_v9, %s2586_s13  ;;  %v1310_v8 = vor.u32 %v1309_v42, %v1306_v54  ;;  %v1682_v29 = vor.u32 %v3314_v3, %v3273_v7  ;;  %v1315_v24 = vrot.slane %v1313_v45, 5  ;;  %v1685_v61 = vshll.u32 %v1589_v12, 16  ;;  %v2509_v42 = vld [vmem:[#allocation3] sm:$0xf] }
 0x203   : > { %1865 = vrot.lane.b32.xlu1 %v2327_v31, %s2582_s17  ;;  %v1324_v63 = vor.u32 %v1323_v28, %v1320_v37  ;;  %v944_v25 = vsel %vm846_vm3, %v3198_v53, 0  ;;  %v1697_v22 = vrot.slane %v1696_v43, 4  ;;  %v1701_v57 = vrot.slane %v1699_v5, 5  ;;  %s2368_s17 = sshll.u32 %s2651_s28, 10  ;;  %s3567_s28 = scalar_lea.sflag [#allocation5], %s269_s14 }
 0x204   : > { %v1311_v47 = vrot.slane %v1310_v8, 4  ;;  %2405 = vmatpush3.bf16.msra.mxu1 %v944_v25  ;;  %v1329_v3 = vrot.slane %v1327_v15, 5  ;;  %v1683_v4 = vrot.slane %v1682_v29, 4  ;;  %v2309_v21 = vcombine.low %v3276_v23, %v3289_v18  ;;  %s3555_s29 = scalar_lea.hbm %s3616_s7, %s2368_s17 }
 0x205   : > { %v1325_v7 = vrot.slane %v1324_v63, 4  ;;  %2414 = vmatprep.subr.bf16.mxu1 %v2501_v52  ;;  %v1687_v40 = vrot.slane %v1685_v61, 5  ;;  %v2310_v35 = vcombine.low %v3370_v17, %v3377_v6  ;;  %v2311_v56 = vcombine.low %v3411_v32, %v3415_v59 }
 0x206   : > { %v1316_v1 = vsel %vm3067_vm13, %v1311_v47, %v1315_v24  ;;  %v2307_v0 = vrot.slane %v1710_v33, 9  ;;  %v1757_v48 = vrot.slane %v1590_v50, 5  ;;  %v1702_v34 = vsel %vm3067_vm13, %v1697_v22, %v1701_v57 }
 0x207   : > { %v1330_v53 = vsel %vm3067_vm13, %v1325_v7, %v1329_v3  ;;  %2407 = vmatmul.mubr.msk.bf16.vlgmr.msra.gmra.mrb[0].mxu1 %vm278_vm0, %v2806_v39  ;;  %v1688_v13 = vsel %vm3067_vm13, %v1683_v4, %v1687_v40  ;;  %v2306_v39 = vrot.slane %v1709_v26, 9  ;;  %v1753_v38 = vrot.slane %v1589_v12, 5 }
 0x208   : > { %v2315_v44 = vcombine.low %v1316_v1, %v1330_v53  ;;  %2415 = vmatpush3.bf16.msra.mxu1 %v2501_v52  ;;  %2410 = vmatprep.mubr.msk.bf16.mxu1 %vm278_vm0, %v2930_v51  ;;  %v2339_v58 = vcombine.low %v1688_v13, %v1702_v34  ;;  %v1758_v14 = vsel %vm3061_vm12, %v2307_v0, %v1757_v48  ;;  %vm2079_vm3 = vcmask 1043456  }
 0x209   : > { %2416 = vmatprep.subr.bf16.mxu1 %v2502_v36  ;;  %v1754_v51 = vsel %vm3061_vm12, %v2306_v39, %v1753_v38  ;;  %v2081_v10 = vsel %vm2079_vm3, %v2506_v41, 0  ;;  %v2308_v11 = vcombine.low %v2509_v42, %v3171_v16  ;;  %vm2018_vm1 = vcmask 523264   ;;  %v2344_v42 = vld [vmem:[%s3613_s4] ss:$0 sm:$0xff] }
 0x20a   : > { %1797 = vrot.lane.b32.xlu1 %v2315_v44, %s2579_s22  ;;  %v2343_v55 = vcombine.low %v1754_v51, %v1758_v14  ;;  %vm2070_vm2 = vcmask 588800  }
 0x20c   : > { %2417 = vmatpush3.bf16.msra.mxu1 %v2502_v36 }
 0x20d   : > { %2418 = vmatprep.subr.bf16.mxu1 %v2504_v46 }
 0x20e   : > { %1933 = vrot.lane.b32.xlu1 %v2339_v58, %s2587_s21 }
 0x20f   : > { %2411 = vmatmul.mubr.msk.bf16.gmra.mrb[4].mxu1 %vm278_vm0, %v2928_v49  ;;  %vm1991_vm0 = vcmask 326656  }
 0x210   : > { %2419 = vmatpush3.bf16.msra.mxu1 %v2504_v46 }
 0x211   : > { %2420 = vmatprep.subr.bf16.mxu1 %v2505_v20 }
 0x212   : > { %1953 = vrot.lane.b32.xlu1 %v2343_v55, %s2586_s13  ;;  %s2514_s13 = sshll.u32 %s2588_s9, 4  ;;  %s2515_s13 = int_to_ptr.vmem [resolvable:$false] %s2514_s13 }
 0x213   : > { %s2516_s21 = scalar_lea.vmem %s2515_s13, 2048  ;;  %p2517_p0 = scmp.lt.s32.totalorder %s3559_s18, %s2515_s13 }
 0x214   : > { %2421 = vmatpush3.bf16.msra.mxu1 %v2505_v20  ;;  %p2518_p1 = scmp.lt.s32.totalorder %s2516_s21, %s2510_s8 }
 0x215   : > { %2434 = vmatprep.subr.msk.bf16.mxu1 %vm2079_vm3, %v2506_v41 }
 0x216   : > { %p2519_p2 = por %p2518_p1, %p2517_p0 }
 0x218   : > { %2423 = vmatpush3.bf16.msra.mxu1 %v2081_v10  ;;  %p2520_p3 = pnand %p2519_p2, %p2513_p13 }
 0x227   : > { %v1842_v27 = vpop.permute.xlu1 %1841 }
 0x228   : > { %v1840_v60 = vpop.permute.xlu0 %1839 }
 0x22c   : > { %v1908_v19 = vpop.permute.xlu0 %1907 }
 0x22e   : > { %v1882_v62 = vpop.permute.xlu1 %1881 }
 0x233   : > { %v1814_v45 = vpop.permute.xlu1 %1813 }
 0x235   : > { %v1812_v30 = vpop.permute.xlu0 %1811 }
 0x23f   : > { %v1880_v49 = vpop.permute.xlu0 %1879 }
 0x243   : > { %v1948_v2 = vpop.permute.xlu0 %1947  ;;  %v1910_v9 = vpop.permute.xlu1 %1909 }
 0x248   : > { %v1792_v54 = vpop.permute.xlu0 %1791  ;;  %v1846_v31 = vpop.permute.xlu1 %1845 }
 0x249   : > { %v1957_v37 = vsel %vm747_vm4, %v2308_v11, %v1792_v54  ;;  %v2271_v11 = vld [vmem:[%s3615_s6] ss:$0 sm:$0xff] }
 0x24a   : > { %v1968_v43 = vsel %vm765_vm6, %v1957_v37, %v1812_v30 }
 0x24b   : > { %v1976_v8 = vsel %vm783_vm8, %v1968_v43, %v1840_v60 }
 0x24c   : > { %v1844_v50 = vpop.permute.xlu0 %1843  ;;  %v1914_v5 = vpop.permute.xlu1 %1913 }
 0x250   : > { %v1912_v12 = vpop.permute.xlu0 %1911 }
 0x253   : > { %v1862_v52 = vpop.permute.xlu1 %1861 }
 0x254   : > { %v1860_v28 = vpop.permute.xlu0 %1859 }
 0x255   : > { %v1984_v15 = vsel %vm801_vm10, %v1976_v8, %v1860_v28 }
 0x256   : > { %v1993_v29 = vsel %vm1991_vm0, %v1984_v15, %v1880_v49 }
 0x257   : > { %v2002_v16 = vsel %vm2000_vm14, %v1993_v29, %v1908_v19 }
 0x258   : > { %v1928_v24 = vpop.permute.xlu0 %1927 }
 0x259   : > { %v2011_v47 = vsel %vm2009_vm15, %v2002_v16, %v1928_v24 }
 0x25a   : > { %v2020_v63 = vsel %vm2018_vm1, %v2011_v47, %v1948_v2 }
 0x25b   : > { %2424 = vmatprep.mubr.msk.bf16.mxu1 %vm2070_vm2, %v2020_v63 }
 0x25c   : > { %v1950_v61 = vpop.permute.xlu0 %1949 }
 0x25d   : > { %v1794_v25 = vpop.permute.xlu1 %1793 }
 0x25e   : > { %v1960_v22 = vsel %vm747_vm4, %v2309_v21, %v1794_v25 }
 0x25f   : > { %v1970_v57 = vsel %vm765_vm6, %v1960_v22, %v1814_v45 }
 0x260   : > { %v1816_v1 = vpop.permute.xlu0 %1815  ;;  %v1978_v7 = vsel %vm783_vm8, %v1970_v57, %v1842_v27 }
 0x261   : > { %v1886_v3 = vpop.permute.xlu1 %1885  ;;  %v1986_v33 = vsel %vm801_vm10, %v1978_v7, %v1862_v52 }
 0x262   : > { %v1995_v26 = vsel %vm1991_vm0, %v1986_v33, %v1882_v62 }
 0x263   : > { %v2004_v53 = vsel %vm2000_vm14, %v1995_v26, %v1910_v9 }
 0x264   : > { %v1884_v4 = vpop.permute.xlu0 %1883 }
 0x265   : > { %v1818_v36 = vpop.permute.xlu1 %1817 }
 0x269   : > { %v1930_v40 = vpop.permute.xlu1 %1929  ;;  %v1864_v44 = vpop.permute.xlu0 %1863 }
 0x26a   : > { %v2013_v23 = vsel %vm2009_vm15, %v2004_v53, %v1930_v40 }
 0x26b   : > { %v2022_v18 = vsel %vm2018_vm1, %v2013_v23, %v1950_v61 }
 0x26c   : > { %2425 = vmatmul.mubr.msk.bf16.vlgmr.msra.gmra.mrb[8].mxu1 %vm2070_vm2, %v2022_v18 }
 0x270   : > { %v1932_v21 = vpop.permute.xlu0 %1931 }
 0x271   : > { %v1796_v0 = vpop.permute.xlu1 %1795 }
 0x272   : > { %v1963_v48 = vsel %vm747_vm4, %v2310_v35, %v1796_v0 }
 0x273   : > { %v1972_v13 = vsel %vm765_vm6, %v1963_v48, %v1816_v1 }
 0x274   : > { %v1980_v34 = vsel %vm783_vm8, %v1972_v13, %v1844_v50  ;;  %v1952_v46 = vpop.permute.xlu0 %1951 }
 0x275   : > { %v1988_v39 = vsel %vm801_vm10, %v1980_v34, %v1864_v44  ;;  %v1866_v51 = vpop.permute.xlu1 %1865 }
 0x276   : > { %v1997_v38 = vsel %vm1991_vm0, %v1988_v39, %v1884_v4 }
 0x277   : > { %v2006_v58 = vsel %vm2000_vm14, %v1997_v38, %v1912_v12 }
 0x278   : > { %v2015_v14 = vsel %vm2009_vm15, %v2006_v58, %v1932_v21 }
 0x279   : > { %v2024_v20 = vsel %vm2018_vm1, %v2015_v14, %v1952_v46 }
 0x27a   : > { %2428 = vmatprep.mubr.msk.bf16.mxu1 %vm2070_vm2, %v2024_v20 }
 0x27c   : > { %v1798_v17 = vpop.permute.xlu1 %1797 }
 0x27d   : > { %v1966_v6 = vsel %vm747_vm4, %v2311_v56, %v1798_v17 }
 0x27e   : > { %v1974_v35 = vsel %vm765_vm6, %v1966_v6, %v1818_v36 }
 0x27f   : > { %v1982_v55 = vsel %vm783_vm8, %v1974_v35, %v1846_v31 }
 0x280   : > { %v1990_v41 = vsel %vm801_vm10, %v1982_v55, %v1866_v51  ;;  %v1934_v10 = vpop.permute.xlu1 %1933 }
 0x281   : > { %v1999_v60 = vsel %vm1991_vm0, %v1990_v41, %v1886_v3 }
 0x282   : > { %v2008_v19 = vsel %vm2000_vm14, %v1999_v60, %v1914_v5 }
 0x283   : > { %v2017_v27 = vsel %vm2009_vm15, %v2008_v19, %v1934_v10 }
 0x284   : > { %v1954_v30 = vpop.permute.xlu1 %1953 }
 0x285   : > { %v2026_v62 = vsel %vm2018_vm1, %v2017_v27, %v1954_v30 }
 0x286   : > { %2429 = vmatmul.mubr.msk.bf16.gmra.mrb[12].mxu1 %vm2070_vm2, %v2026_v62 }
 0x2da   : > { %v2408_v32 = vpop.f32.mrb[0].mxu1 }
 0x2db   : > { %v980_v59 = vpop.f32.mrb[1].mxu1  ;;  %v989_v5 = vadd.f32 %v2408_v32, %v2271_v11 }
 0x2dc   : > { %v2409_v56 = vpop.f32.mrb[2].mxu1  ;;  %v981_v29 = vadd.f32 %v2271_v11, %v980_v59 }
 0x2dd   : > { %v983_v49 = vpop.f32.mrb[3].mxu1  ;;  %v992_v24 = vadd.f32 %v2409_v56, %v2271_v11 }
 0x2de   : > { %v984_v61 = vadd.f32 %v2271_v11, %v983_v49 }
 0x2e2   : > { %v2412_v45 = vpop.f32.mrb[4].mxu1 }
 0x2e3   : > { %v996_v2 = vpop.f32.mrb[5].mxu1  ;;  %v1005_v23 = vadd.f32 %v2412_v45, %v2271_v11 }
 0x2e4   : > { %v2413_v9 = vpop.f32.mrb[6].mxu1  ;;  %v997_v48 = vadd.f32 %v2271_v11, %v996_v2 }
 0x2e5   : > { %v999_v54 = vpop.f32.mrb[7].mxu1  ;;  %v1008_v39 = vadd.f32 %v2413_v9, %v2271_v11 }
 0x2e6   : > { %v1000_v58 = vadd.f32 %v2271_v11, %v999_v54 }
 0x33f   : > { %v2426_v50 = vpop.f32.mrb[8].mxu1 }
 0x340   : > { %v2126_v31 = vadd.f32 %v2426_v50, %v2344_v42  ;;  %v2117_v37 = vpop.f32.mrb[9].mxu1 }
 0x341   : > { %v2118_v12 = vadd.f32 %v2344_v42, %v2117_v37  ;;  %v2427_v43 = vpop.f32.mrb[10].mxu1 }
 0x342   : > { %v2150_v8 = vmax.f32 %v2126_v31, 0.0  ;;  %v2129_v28 = vadd.f32 %v2427_v43, %v2344_v42  ;;  %v2120_v15 = vpop.f32.mrb[11].mxu1 }
 0x343   : > { %v2148_v16 = vmax.f32 %v2118_v12, 0.0  ;;  %v2121_v52 = vadd.f32 %v2344_v42, %v2120_v15 }
 0x344   : > { %v2158_v47 = vadd.f32 %v2150_v8, %v989_v5  ;;  %v2151_v63 = vmax.f32 %v2129_v28, 0.0 }
 0x345   : > { %v2156_v25 = vadd.f32 %v2148_v16, %v981_v29  ;;  %v2149_v22 = vmax.f32 %v2121_v52, 0.0 }
 0x346   : > { %v2166_v57 = vmax.f32 %v2158_v47, 0.0  ;;  %v2159_v1 = vadd.f32 %v2151_v63, %v992_v24 }
 0x347   : > { %v2164_v7 = vmax.f32 %v2156_v25, 0.0  ;;  %v2157_v3 = vadd.f32 %v2149_v22, %v984_v61 }
 0x348   : > { %2174 = vst.msk [vmem:[%s3538_s16 + $0x10] sm:$0xff] %vm747_vm4, %v2166_v57  ;;  %v2167_v4 = vmax.f32 %v2159_v1, 0.0 }
 0x349   : > { %2172 = vst.msk [vmem:[%s3538_s16] sm:$0xff] %vm747_vm4, %v2164_v7  ;;  %v2165_v33 = vmax.f32 %v2157_v3, 0.0 }
 0x34a   : > { %2175 = vst.msk [vmem:[%s3538_s16 + $0x18] sm:$0xff] %vm747_vm4, %v2167_v4 }
 0x34b   : > { %2173 = vst.msk [vmem:[%s3538_s16 + $0x8] sm:$0xff] %vm747_vm4, %v2165_v33 }
 0x359   : > { %v2430_v36 = vpop.f32.mrb[12].mxu1 }
 0x35a   : > { %v2142_v26 = vadd.f32 %v2430_v36, %v2344_v42  ;;  %v2133_v53 = vpop.f32.mrb[13].mxu1 }
 0x35b   : > { %v2134_v40 = vadd.f32 %v2344_v42, %v2133_v53  ;;  %v2431_v44 = vpop.f32.mrb[14].mxu1 }
 0x35c   : > { %v2154_v18 = vmax.f32 %v2142_v26, 0.0  ;;  %v2145_v21 = vadd.f32 %v2431_v44, %v2344_v42  ;;  %v2136_v0 = vpop.f32.mrb[15].mxu1 }
 0x35d   : > { %v2152_v13 = vmax.f32 %v2134_v40, 0.0  ;;  %v2137_v34 = vadd.f32 %v2344_v42, %v2136_v0 }
 0x35e   : > { %v2162_v38 = vadd.f32 %v2154_v18, %v1005_v23  ;;  %v2155_v46 = vmax.f32 %v2145_v21, 0.0 }
 0x35f   : > { %v2160_v51 = vadd.f32 %v2152_v13, %v997_v48  ;;  %v2153_v14 = vmax.f32 %v2137_v34, 0.0 }
 0x360   : > { %v2170_v20 = vmax.f32 %v2162_v38, 0.0  ;;  %v2163_v17 = vadd.f32 %v2155_v46, %v1008_v39 }
 0x361   : > { %v2168_v6 = vmax.f32 %v2160_v51, 0.0  ;;  %v2161_v35 = vadd.f32 %v2153_v14, %v1000_v58 }
 0x362   : > { %2178 = vst.msk [vmem:[%s3538_s16 + $0x30] sm:$0xff] %vm747_vm4, %v2170_v20  ;;  %v2171_v55 = vmax.f32 %v2163_v17, 0.0 }
 0x363   : > { %2176 = vst.msk [vmem:[%s3538_s16 + $0x20] sm:$0xff] %vm747_vm4, %v2168_v6  ;;  %v2169_v41 = vmax.f32 %v2161_v35, 0.0 }
 0x364   : > { %2179 = vst.msk [vmem:[%s3538_s16 + $0x38] sm:$0xff] %vm747_vm4, %v2171_v55 }
 0x365   : > { %2177 = vst.msk [vmem:[%s3538_s16 + $0x28] sm:$0xff] %vm747_vm4, %v2169_v41 }
 0x366   : > { %2523 = shalt.err (!%p2520_p3)
}
 0x367   : > { %s2524_s20 = scalar_lea.hbm %s3555_s29, 1024  ;;  %s2528_s16 = scalar_lea.hbm %s3616_s7, 2048 }
 0x368   : > { %p2525_p4 = scmp.ne.s32.totalorder %s3555_s29, %s2524_s20  ;;  %p2529_p9 = scmp.lt.u32.totalorder %s3555_s29, %s3616_s7 }
 0x369   : > { %p2530_p10 = scmp.lt.u32.totalorder %s2528_s16, %s2524_s20  ;;  %p2532_p12 = scmp.lt.u32.totalorder %s2524_s20, %s3555_s29 }
 0x36a   : > { %p2526_p7 = pnand %p2525_p4, %p2668_p5 }
 0x36b   : > { %p2531_p11 = por %p2530_p10, %p2529_p9 }
 0x36c   : > { %p2527_p8 = pneg %p2526_p7 }
 0x36d   : > { %p2533_p13 = por %p2532_p12, %p2531_p11 }
 0x36f   : > { %p2534_p0 = pnand %p2533_p13, %p2527_p8 }
 0x371   : > { %2537 = shalt.err (!%p2534_p0)
}
 0x372   : > { %s2589_s23 = smov 128  }
 0x373   : > { %2435 = dma.vmem_to_hbm [thread:$0]  (%p2668_p5), %s3559_s18, 1024, %s3555_s29, %s3567_s28, %s2589_s23, %s2589_s23, %s2579_s22  }
 0x374 PF: > { %p2441_p1 = scmp.ge.s32.totalorder %s2572_s27, 2  ;;  %s2209_s8 = sand.u32 1, %s2560_s24  }
 0x375   : > { %s2210_s9 = scalar_lea.sflag [#allocation5], %s2209_s8 }
 0x376   : > { %p2438_p2 = pnand %p2441_p1, %p2672_p6 }
 0x378   : > { %2555 = dma.done.wait (!%p2438_p2), %s2210_s9, 1024  }
 0x379   : > { %2557 = vsyncadd (!%p2438_p2), %s2210_s9, 4294966272  ;;  %p17_p3 = scmp.ge.s32.totalorder %s2655_s30, 4   ;;  %s3629_s24 = smov %s2564_s25 }
 0x37a   : > { %s3630_s25 = smov %s2568_s26  ;;  %s3631_s26 = smov %s2666_s10 }
 0x37b   : > { %s3632_s27 = smov %s2655_s30  ;;  %19 = sbr.rel (!%p17_p3) target bundleno = 3 (0x3), region = 136 }
 0x382   :  { %2215 = vsyncpa [#allocation5], 1 }
 0x383   :  { %2217 = vsyncpa [#allocation5 + $0x1], 1 }

</bundles_post_ra>
